<compile_context>
chip_gen: v6e
topology: v6e:2x2x1
jax: 0.10.0
libtpu: 0.0.40
codegen_flags: <defaults>
</compile_context>

<pallas_src>
import inspect

import jax
import jax.numpy as jnp
from jax.experimental import pallas as pl
from jax.experimental.pallas import tpu as pltpu

EPS = 1e-5
_TILE_CANDIDATES = (2048, 1024, 512, 256, 128, 64, 32, 16, 8)


def _supports_single_buffering() -> bool:
    if not hasattr(pl, "Buffered"):
        return False
    try:
        return "pipeline_mode" in inspect.signature(pl.BlockSpec).parameters
    except (TypeError, ValueError):
        return False


_SINGLE_BUFFER_OK = _supports_single_buffering()


def _round_up(x: int, m: int) -> int:
    return ((x + m - 1) // m) * m


def _make_kernel(inv_n: float, compute_dtype, tb: int, use_cache: bool):
    """Fused Batch_Net kernel.  grid = (phase, batch_tile); phase is the slow axis.

    phase 0: a1 = x @ W1, accumulate BN1 batch stats (cache a1 in VMEM)
    phase 1: a2 = relu(bn1(a1)) @ W2, accumulate BN2 batch stats (cache a2)
    phase 2: out = relu(bn2(a2)) @ W3 + b3  (only phase that writes the output)
    """

    def kernel(x_ref, w1_ref, g1_ref, be1_ref, w2_ref, g2_ref, be2_ref,
               w3_ref, b3_ref, out_ref,
               sum1, sq1, sum2, sq2, sc1, sh1, sc2, sh2, *cache_refs):
        if use_cache:
            a1_cache, a2_cache = cache_refs

        p = pl.program_id(0)                      # phase (slow axis)
        i = pl.program_id(1)                      # batch tile (fast axis)
        row0 = pl.multiple_of(i * tb, tb)

        def lin1():
            return jnp.dot(x_ref[...].astype(compute_dtype), w1_ref[...],
                           preferred_element_type=jnp.float32)

        def finalize(s_ref, q_ref, g_ref, b_ref, scale_ref, shift_ref):
            # Full-batch biased mean/var -> fused scale/shift, computed ONCE per
            # phase (hoisted out of the per-tile path).  rsqrt -> EUP slot.
            mean = s_ref[...] * inv_n
            var = q_ref[...] * inv_n - mean * mean     # biased, E[a^2]-E[a]^2
            scale = g_ref[...] * jax.lax.rsqrt(var + EPS)
            scale_ref[...] = scale
            shift_ref[...] = b_ref[...] - mean * scale

        def bn_relu(a, scale_ref, shift_ref):
            return jnp.maximum(a * scale_ref[...] + shift_ref[...], 0.0)

        # ---------------- phase 0: BN1 statistics ----------------
        @pl.when(p == 0)
        def _():
            @pl.when(i == 0)
            def _():
                sum1[...] = jnp.zeros_like(sum1)
                sq1[...] = jnp.zeros_like(sq1)

            a1 = lin1()
            if use_cache:
                a1_cache[pl.ds(row0, tb), :] = a1
            sum1[...] += jnp.sum(a1, axis=0, keepdims=True)
            sq1[...] += jnp.sum(a1 * a1, axis=0, keepdims=True)

        # ---------------- phase 1: BN2 statistics ----------------
        @pl.when(p == 1)
        def _():
            @pl.when(i == 0)
            def _():
                sum2[...] = jnp.zeros_like(sum2)
                sq2[...] = jnp.zeros_like(sq2)
                finalize(sum1, sq1, g1_ref, be1_ref, sc1, sh1)

            a1 = a1_cache[pl.ds(row0, tb), :] if use_cache else lin1()
            h1 = bn_relu(a1, sc1, sh1)
            a2 = jnp.dot(h1.astype(compute_dtype), w2_ref[...],
                         preferred_element_type=jnp.float32)
            if use_cache:
                a2_cache[pl.ds(row0, tb), :] = a2
            sum2[...] += jnp.sum(a2, axis=0, keepdims=True)
            sq2[...] += jnp.sum(a2 * a2, axis=0, keepdims=True)

        # ---------------- phase 2: full forward, write output ----------------
        @pl.when(p == 2)
        def _():
            @pl.when(i == 0)
            def _():
                finalize(sum2, sq2, g2_ref, be2_ref, sc2, sh2)

            if use_cache:
                a2 = a2_cache[pl.ds(row0, tb), :]
            else:
                h1 = bn_relu(lin1(), sc1, sh1)
                a2 = jnp.dot(h1.astype(compute_dtype), w2_ref[...],
                             preferred_element_type=jnp.float32)
            h2 = bn_relu(a2, sc2, sh2)
            out_ref[...] = (jnp.dot(h2.astype(compute_dtype), w3_ref[...],
                                    preferred_element_type=jnp.float32)
                            + b3_ref[...]).astype(out_ref.dtype)

    return kernel


def batch_net_forward(x, params, *, tile_batch=None, bf16_matmul=True,
                      cache_activations=None, pad_output=False):
    """Forward pass of Batch_Net as a single fused Pallas TPU kernel."""
    (w1, b1, g1, be1, w2, b2, g2, be2, w3, b3) = params
    del b1, b2  # pre-BN Linear biases are exactly cancelled by the mean subtraction

    n, in_dim = x.shape
    h1 = w1.shape[1]
    h2 = w2.shape[1]
    out_dim = w3.shape[1]

    # Output width: narrow unpadded block (masked stores, 8x less HBM write traffic
    # for out_dim=16) by default; lane-dense 128-padded slab behind a flag.
    out_w = _round_up(out_dim, 128) if pad_output else out_dim
    w3p = jnp.pad(w3, ((0, 0), (0, out_w - out_dim)))
    b3p = jnp.pad(b3, ((0, 0), (0, out_w - out_dim)))

    compute_dtype = jnp.bfloat16 if bf16_matmul else jnp.float32
    w_item = jnp.dtype(compute_dtype).itemsize
    xq = x.astype(compute_dtype)
    w1q, w2q, w3q = (w.astype(compute_dtype) for w in (w1, w2, w3p))

    # ---------------- generation-aware VMEM planning ----------------
    try:
        phys_vmem = int(pltpu.get_tpu_info().vmem_capacity_bytes)
    except Exception:
        phys_vmem = 64 * 1024 * 1024              # conservative: v7x per-TC VMEM
    budget = int(phys_vmem * 0.75)                # headroom for compiler scratch

    def buf_bytes(rows, cols, itemsize):
        return _round_up(max(rows, 1), 8) * _round_up(cols, 128) * itemsize

    resident = (buf_bytes(in_dim, h1, w_item) + buf_bytes(h1, h2, w_item)
                + buf_bytes(h2, out_w, w_item)
                + 2 * buf_bytes(1, h1, 4) + 2 * buf_bytes(1, h2, 4)
                + buf_bytes(1, out_w, 4))
    if not _SINGLE_BUFFER_OK:
        resident *= 2                             # default double-buffering of residents
    stats = 4 * buf_bytes(1, h1, 4) + 4 * buf_bytes(1, h2, 4)
    cache_bytes = buf_bytes(n, h1, 4) + buf_bytes(n, h2, 4)

    def tile_bytes(t):                            # double-buffered x tile + out tile
        return 2 * (buf_bytes(t, in_dim, w_item) + buf_bytes(t, out_w, 4))

    if cache_activations is None:
        use_cache = resident + stats + cache_bytes + tile_bytes(8) <= budget
    else:
        use_cache = bool(cache_activations)
    fixed = resident + stats + (cache_bytes if use_cache else 0)

    if tile_batch is not None:
        tb = tile_batch if n % tile_batch == 0 else n
    else:
        tb = n
        for cand in _TILE_CANDIDATES:             # largest VMEM-fitting divisor
            if n % cand == 0 and fixed + tile_bytes(cand) <= budget:
                tb = cand
                break
    n_tiles = n // tb

    needed = fixed + tile_bytes(tb)
    vmem_limit = min(max(16 * 1024 * 1024, int(needed * 1.25)), budget)

    # ---------------- specs / scratch / cost ----------------
    grid = (3, n_tiles)
    kernel = _make_kernel(1.0 / n, compute_dtype, tb, use_cache)

    def x_map(p, i):
        if use_cache:
            return (jnp.where(p == 0, i, 0), 0)   # x only streamed during phase 0
        return (i, 0)

    def out_map(p, i):
        # Revisited during the statistics phases: block index only advances in
        # phase 2, so each output block is written back to HBM exactly once.
        return (jnp.where(p == 2, i, 0), 0)

    def resident_map(p, i):
        return (0, 0)                             # DMA'd once, stays VMEM-resident

    scratch = [
        pltpu.VMEM((1, h1), jnp.float32),         # sum(a1)
        pltpu.VMEM((1, h1), jnp.float32),         # sum(a1^2)
        pltpu.VMEM((1, h2), jnp.float32),         # sum(a2)
        pltpu.VMEM((1, h2), jnp.float32),         # sum(a2^2)
        pltpu.VMEM((1, h1), jnp.float32),         # BN1 scale
        pltpu.VMEM((1, h1), jnp.float32),         # BN1 shift
        pltpu.VMEM((1, h2), jnp.float32),         # BN2 scale
        pltpu.VMEM((1, h2), jnp.float32),         # BN2 shift
    ]
    if use_cache:
        scratch += [pltpu.VMEM((n, h1), jnp.float32),   # a1 cache (full batch)
                    pltpu.VMEM((n, h2), jnp.float32)]   # a2 cache (full batch)

    cost = pl.CostEstimate(
        flops=int(2 * n * ((1 if use_cache else 3) * in_dim * h1
                           + (1 if use_cache else 2) * h1 * h2
                           + h2 * out_w)),
        transcendentals=int(h1 + h2),
        bytes_accessed=int((1 if use_cache else 3) * n * in_dim * w_item
                           + (in_dim * h1 + h1 * h2 + h2 * out_w) * w_item
                           + (2 * h1 + 2 * h2 + out_w) * 4
                           + n * out_w * 4),
    )

    def build(single_buffer_weights):
        def rspec(shape):
            if single_buffer_weights:
                return pl.BlockSpec(shape, resident_map,
                                    pipeline_mode=pl.Buffered(1))
            return pl.BlockSpec(shape, resident_map)

        return pl.pallas_call(
            kernel,
            out_shape=jax.ShapeDtypeStruct((n, out_w), jnp.float32),
            grid_spec=pltpu.PrefetchScalarGridSpec(
                num_scalar_prefetch=0,
                grid=grid,
                in_specs=[
                    pl.BlockSpec((tb, in_dim), x_map),   # x (batch tiled)
                    rspec((in_dim, h1)),                 # W1
                    rspec((1, h1)),                      # gamma1
                    rspec((1, h1)),                      # beta1
                    rspec((h1, h2)),                     # W2
                    rspec((1, h2)),                      # gamma2
                    rspec((1, h2)),                      # beta2
                    rspec((h2, out_w)),                  # W3 (optionally lane-padded)
                    rspec((1, out_w)),                   # b3
                ],
                out_specs=pl.BlockSpec((tb, out_w), out_map),
                scratch_shapes=scratch,
            ),
            compiler_params=pltpu.CompilerParams(
                # Phase axis is a sequential dependency; the batch axis shares the
                # BN-statistics accumulators -> both must stay "arbitrary".
                dimension_semantics=("arbitrary", "arbitrary"),
                vmem_limit_bytes=vmem_limit,
            ),
            cost_estimate=cost,
        )

    args = (xq, w1q, g1, be1, w2q, g2, be2, w3q, b3p)
    try:
        out = build(_SINGLE_BUFFER_OK)(*args)
    except Exception:
        if not _SINGLE_BUFFER_OK:
            raise
        out = build(False)(*args)                 # retry without single-buffering

    return out[:, :out_dim]


def make_params(key, in_dim, h1, h2, out_dim):
    """Deterministic synthetic init mirroring PyTorch defaults (not a checkpoint)."""
    ks = jax.random.split(key, 3)

    def lin(k, fan_in, fan_out):
        bound = 1.0 / jnp.sqrt(fan_in)
        kw, kb = jax.random.split(k)
        w = jax.random.uniform(kw, (fan_in, fan_out), jnp.float32, -bound, bound)
        b = jax.random.uniform(kb, (1, fan_out), jnp.float32, -bound, bound)
        return w, b

    w1, b1 = lin(ks[0], in_dim, h1)
    w2, b2 = lin(ks[1], h1, h2)
    w3, b3 = lin(ks[2], h2, out_dim)
    # BatchNorm affine params at PyTorch default init: weight=1, bias=0.
    g1, be1 = jnp.ones((1, h1), jnp.float32), jnp.zeros((1, h1), jnp.float32)
    g2, be2 = jnp.ones((1, h2), jnp.float32), jnp.zeros((1, h2), jnp.float32)
    return (w1, b1, g1, be1, w2, b2, g2, be2, w3, b3)


def reference_forward(x, params, *, bf16_matmul=False):
    """Pure-JAX reference of the PyTorch module (training-mode BatchNorm)."""
    (w1, b1, g1, be1, w2, b2, g2, be2, w3, b3) = params
    cdt = jnp.bfloat16 if bf16_matmul else jnp.float32

    def dot(a, w):
        return jnp.dot(a.astype(cdt), w.astype(cdt),
                       preferred_element_type=jnp.float32)

    def bn(h, g, be):
        mu = h.mean(0, keepdims=True)
        var = h.var(0, keepdims=True)            # biased, as in torch BN training
        return (h - mu) * jax.lax.rsqrt(var + EPS) * g + be

    h = jnp.maximum(bn(dot(x, w1) + b1, g1, be1), 0.0)
    h = jnp.maximum(bn(dot(h, w2) + b2, g2, be2), 0.0)
    return dot(h, w3) + b3


if __name__ == "__main__":
    key = jax.random.PRNGKey(0)
    kx, kp = jax.random.split(key)

    batch, in_dim, h1, h2, out_dim = 64, 32, 64, 64, 16
    x = jax.random.normal(kx, (batch, in_dim), jnp.float32)
    params = make_params(kp, in_dim, h1, h2, out_dim)

    ref_f32 = reference_forward(x, params)

    # 1) f32 path, 4 batch tiles (cross-tile BN stats), VMEM activation cache,
    #    revisited output blocks, unpadded (lane-masked) output stores.
    out_a = batch_net_forward(x, params, tile_batch=16, bf16_matmul=False,
                              cache_activations=True)
    jax.block_until_ready(out_a)
    assert out_a.shape == (batch, out_dim)
    assert jnp.allclose(out_a, ref_f32, atol=5e-4, rtol=5e-4), (
        float(jnp.max(jnp.abs(out_a - ref_f32))))

    # 2) f32 path, recompute fallback (no activation cache) + lane-padded output.
    out_b = batch_net_forward(x, params, tile_batch=16, bf16_matmul=False,
                              cache_activations=False, pad_output=True)
    jax.block_until_ready(out_b)
    assert out_b.shape == (batch, out_dim)
    assert jnp.allclose(out_b, ref_f32, atol=5e-4, rtol=5e-4), (
        float(jnp.max(jnp.abs(out_b - ref_f32))))

    # 3) Default bf16 MXU path with automatic tiling / cache / VMEM planning;
    #    compared against a precision-matched reference.
    out_c = batch_net_forward(x, params)
    jax.block_until_ready(out_c)
    ref_bf16 = reference_forward(x, params, bf16_matmul=True)
    assert out_c.shape == (batch, out_dim)
    assert jnp.allclose(out_c, ref_bf16, atol=3e-3, rtol=3e-3), (
        float(jnp.max(jnp.abs(out_c - ref_bf16))))

    print("KERNEL_OK")
</pallas_src>

<mosaic_0001>
module attributes {stable_mosaic.version = 11 : i64} {
  func.func @kernel(%arg0: i32, %arg1: i32, %arg2: memref<16x32xf32, #tpu.memory_space<vmem>>, %arg3: memref<32x64xf32, #tpu.memory_space<vmem>>, %arg4: memref<1x64xf32, #tpu.memory_space<vmem>>, %arg5: memref<1x64xf32, #tpu.memory_space<vmem>>, %arg6: memref<64x64xf32, #tpu.memory_space<vmem>>, %arg7: memref<1x64xf32, #tpu.memory_space<vmem>>, %arg8: memref<1x64xf32, #tpu.memory_space<vmem>>, %arg9: memref<64x16xf32, #tpu.memory_space<vmem>>, %arg10: memref<1x16xf32, #tpu.memory_space<vmem>>, %arg11: memref<16x16xf32, #tpu.memory_space<vmem>>, %arg12: memref<1x64xf32, #tpu.memory_space<vmem>>, %arg13: memref<1x64xf32, #tpu.memory_space<vmem>>, %arg14: memref<1x64xf32, #tpu.memory_space<vmem>>, %arg15: memref<1x64xf32, #tpu.memory_space<vmem>>, %arg16: memref<1x64xf32, #tpu.memory_space<vmem>>, %arg17: memref<1x64xf32, #tpu.memory_space<vmem>>, %arg18: memref<1x64xf32, #tpu.memory_space<vmem>>, %arg19: memref<1x64xf32, #tpu.memory_space<vmem>>, %arg20: memref<64x64xf32, #tpu.memory_space<vmem>>, %arg21: memref<64x64xf32, #tpu.memory_space<vmem>>) attributes {dimension_semantics = [#tpu.dimension_semantics<arbitrary>, #tpu.dimension_semantics<arbitrary>], iteration_bounds = array<i64: 3, 4>, scalar_prefetch = 0 : i64, scratch_operands = 10 : i64, tpu.core_type = #tpu.core_type<tc>, window_params = [{transform_indices = @transform_0, window_bounds = array<i64: 16, 32>}, {pipeline_mode = #tpu.pipeline_mode<synchronous>, transform_indices = @transform_1, window_bounds = array<i64: 32, 64>}, {pipeline_mode = #tpu.pipeline_mode<synchronous>, transform_indices = @transform_2, window_bounds = array<i64: 1, 64>}, {pipeline_mode = #tpu.pipeline_mode<synchronous>, transform_indices = @transform_3, window_bounds = array<i64: 1, 64>}, {pipeline_mode = #tpu.pipeline_mode<synchronous>, transform_indices = @transform_4, window_bounds = array<i64: 64, 64>}, {pipeline_mode = #tpu.pipeline_mode<synchronous>, transform_indices = @transform_5, window_bounds = array<i64: 1, 64>}, {pipeline_mode = #tpu.pipeline_mode<synchronous>, transform_indices = @transform_6, window_bounds = array<i64: 1, 64>}, {pipeline_mode = #tpu.pipeline_mode<synchronous>, transform_indices = @transform_7, window_bounds = array<i64: 64, 16>}, {pipeline_mode = #tpu.pipeline_mode<synchronous>, transform_indices = @transform_8, window_bounds = array<i64: 1, 16>}, {transform_indices = @transform_9, window_bounds = array<i64: 16, 16>}]} {
    %c16_i32 = arith.constant 16 : i32
    %0 = arith.muli %arg1, %c16_i32 : i32
    %1 = tpu.assume_multiple %0, 16 : i32
    %c0_i32 = arith.constant 0 : i32
    %2 = arith.cmpi eq, %arg0, %c0_i32 : i32
    %3 = arith.extui %2 : i1 to i32
    %c0_i32_0 = arith.constant 0 : i32
    %4 = arith.cmpi ne, %3, %c0_i32_0 : i32
    scf.if %4 {
      %c0_i32_3 = arith.constant 0 : i32
      %11 = arith.cmpi eq, %arg1, %c0_i32_3 : i32
      %12 = arith.extui %11 : i1 to i32
      %c0_i32_4 = arith.constant 0 : i32
      %13 = arith.cmpi ne, %12, %c0_i32_4 : i32
      scf.if %13 {
        %cst_19 = arith.constant 0.000000e+00 : f32
        %30 = vector.broadcast %cst_19 : f32 to vector<1x64xf32>
        %c0_20 = arith.constant 0 : index
        %c0_21 = arith.constant 0 : index
        %31 = vector.load %arg12[%c0_20, %c0_21] : memref<1x64xf32, #tpu.memory_space<vmem>>, vector<1x64xf32>
        tpu.vector_store %arg12[%c0_20, %c0_21], %30 {strides = array<i32>} : memref<1x64xf32, #tpu.memory_space<vmem>>, vector<1x64xf32>,
        %cst_22 = arith.constant 0.000000e+00 : f32
        %32 = vector.broadcast %cst_22 : f32 to vector<1x64xf32>
        %c0_23 = arith.constant 0 : index
        %c0_24 = arith.constant 0 : index
        %33 = vector.load %arg13[%c0_23, %c0_24] : memref<1x64xf32, #tpu.memory_space<vmem>>, vector<1x64xf32>
        tpu.vector_store %arg13[%c0_23, %c0_24], %32 {strides = array<i32>} : memref<1x64xf32, #tpu.memory_space<vmem>>, vector<1x64xf32>,
      } else {
      }
      %c0 = arith.constant 0 : index
      %c0_5 = arith.constant 0 : index
      %14 = vector.load %arg2[%c0, %c0_5] : memref<16x32xf32, #tpu.memory_space<vmem>>, vector<16x32xf32>
      %c0_6 = arith.constant 0 : index
      %c0_7 = arith.constant 0 : index
      %15 = vector.load %arg3[%c0_6, %c0_7] : memref<32x64xf32, #tpu.memory_space<vmem>>, vector<32x64xf32>
      %cst = arith.constant dense<0.000000e+00> : vector<16x64xf32>
      %16 = tpu.matmul %14, %15, %cst {dimension_numbers = #tpu.dot_dimension_numbers<[1], [0], [0], [1], [0, 0, 1, 1], [], []>} : vector<16x32xf32>, vector<32x64xf32>, vector<16x64xf32> -> vector<16x64xf32>
      %17 = arith.index_cast %1 : i32 to index
      %c0_8 = arith.constant 0 : index
      %18 = vector.load %arg20[%17, %c0_8] : memref<64x64xf32, #tpu.memory_space<vmem>>, vector<16x64xf32>
      tpu.vector_store %arg20[%17, %c0_8], %16 {strides = array<i32>} : memref<64x64xf32, #tpu.memory_space<vmem>>, vector<16x64xf32>,
      %c0_9 = arith.constant 0 : index
      %c0_10 = arith.constant 0 : index
      %19 = vector.load %arg12[%c0_9, %c0_10] : memref<1x64xf32, #tpu.memory_space<vmem>>, vector<1x64xf32>
      %cst_11 = arith.constant dense<0.000000e+00> : vector<64xf32>
      %20 = vector.multi_reduction <add>, %16, %cst_11 [0] : vector<16x64xf32> to vector<64xf32>
      %21 = vector.shape_cast %20 : vector<64xf32> to vector<1x64xf32>
      %22 = arith.addf %19, %21 : vector<1x64xf32>
      %c0_12 = arith.constant 0 : index
      %c0_13 = arith.constant 0 : index
      %23 = vector.load %arg12[%c0_12, %c0_13] : memref<1x64xf32, #tpu.memory_space<vmem>>, vector<1x64xf32>
      tpu.vector_store %arg12[%c0_12, %c0_13], %22 {strides = array<i32>} : memref<1x64xf32, #tpu.memory_space<vmem>>, vector<1x64xf32>,
      %c0_14 = arith.constant 0 : index
      %c0_15 = arith.constant 0 : index
      %24 = vector.load %arg13[%c0_14, %c0_15] : memref<1x64xf32, #tpu.memory_space<vmem>>, vector<1x64xf32>
      %25 = arith.mulf %16, %16 : vector<16x64xf32>
      %cst_16 = arith.constant dense<0.000000e+00> : vector<64xf32>
      %26 = vector.multi_reduction <add>, %25, %cst_16 [0] : vector<16x64xf32> to vector<64xf32>
      %27 = vector.shape_cast %26 : vector<64xf32> to vector<1x64xf32>
      %28 = arith.addf %24, %27 : vector<1x64xf32>
      %c0_17 = arith.constant 0 : index
      %c0_18 = arith.constant 0 : index
      %29 = vector.load %arg13[%c0_17, %c0_18] : memref<1x64xf32, #tpu.memory_space<vmem>>, vector<1x64xf32>
      tpu.vector_store %arg13[%c0_17, %c0_18], %28 {strides = array<i32>} : memref<1x64xf32, #tpu.memory_space<vmem>>, vector<1x64xf32>,
    } else {
    }
    %c1_i32 = arith.constant 1 : i32
    %5 = arith.cmpi eq, %arg0, %c1_i32 : i32
    %6 = arith.extui %5 : i1 to i32
    %c0_i32_1 = arith.constant 0 : i32
    %7 = arith.cmpi ne, %6, %c0_i32_1 : i32
    scf.if %7 {
      %c0_i32_3 = arith.constant 0 : i32
      %11 = arith.cmpi eq, %arg1, %c0_i32_3 : i32
      %12 = arith.extui %11 : i1 to i32
      %c0_i32_4 = arith.constant 0 : i32
      %13 = arith.cmpi ne, %12, %c0_i32_4 : i32
      scf.if %13 {
        %cst_23 = arith.constant 0.000000e+00 : f32
        %39 = vector.broadcast %cst_23 : f32 to vector<1x64xf32>
        %c0_24 = arith.constant 0 : index
        %c0_25 = arith.constant 0 : index
        %40 = vector.load %arg14[%c0_24, %c0_25] : memref<1x64xf32, #tpu.memory_space<vmem>>, vector<1x64xf32>
        tpu.vector_store %arg14[%c0_24, %c0_25], %39 {strides = array<i32>} : memref<1x64xf32, #tpu.memory_space<vmem>>, vector<1x64xf32>,
        %cst_26 = arith.constant 0.000000e+00 : f32
        %41 = vector.broadcast %cst_26 : f32 to vector<1x64xf32>
        %c0_27 = arith.constant 0 : index
        %c0_28 = arith.constant 0 : index
        %42 = vector.load %arg15[%c0_27, %c0_28] : memref<1x64xf32, #tpu.memory_space<vmem>>, vector<1x64xf32>
        tpu.vector_store %arg15[%c0_27, %c0_28], %41 {strides = array<i32>} : memref<1x64xf32, #tpu.memory_space<vmem>>, vector<1x64xf32>,
        %c0_29 = arith.constant 0 : index
        %c0_30 = arith.constant 0 : index
        %43 = vector.load %arg12[%c0_29, %c0_30] : memref<1x64xf32, #tpu.memory_space<vmem>>, vector<1x64xf32>
        %cst_31 = arith.constant 1.562500e-02 : f32
        %44 = vector.broadcast %cst_31 : f32 to vector<1x64xf32>
        %45 = arith.mulf %43, %44 : vector<1x64xf32>
        %c0_32 = arith.constant 0 : index
        %c0_33 = arith.constant 0 : index
        %46 = vector.load %arg13[%c0_32, %c0_33] : memref<1x64xf32, #tpu.memory_space<vmem>>, vector<1x64xf32>
        %cst_34 = arith.constant 1.562500e-02 : f32
        %47 = vector.broadcast %cst_34 : f32 to vector<1x64xf32>
        %48 = arith.mulf %46, %47 : vector<1x64xf32>
        %49 = arith.mulf %45, %45 : vector<1x64xf32>
        %50 = arith.subf %48, %49 : vector<1x64xf32>
        %c0_35 = arith.constant 0 : index
        %c0_36 = arith.constant 0 : index
        %51 = vector.load %arg4[%c0_35, %c0_36] : memref<1x64xf32, #tpu.memory_space<vmem>>, vector<1x64xf32>
        %cst_37 = arith.constant 9.99999974E-6 : f32
        %52 = vector.broadcast %cst_37 : f32 to vector<1x64xf32>
        %53 = arith.addf %50, %52 : vector<1x64xf32>
        %54 = math.rsqrt %53 : vector<1x64xf32>
        %55 = arith.mulf %51, %54 : vector<1x64xf32>
        %c0_38 = arith.constant 0 : index
        %c0_39 = arith.constant 0 : index
        %56 = vector.load %arg16[%c0_38, %c0_39] : memref<1x64xf32, #tpu.memory_space<vmem>>, vector<1x64xf32>
        tpu.vector_store %arg16[%c0_38, %c0_39], %55 {strides = array<i32>} : memref<1x64xf32, #tpu.memory_space<vmem>>, vector<1x64xf32>,
        %c0_40 = arith.constant 0 : index
        %c0_41 = arith.constant 0 : index
        %57 = vector.load %arg5[%c0_40, %c0_41] : memref<1x64xf32, #tpu.memory_space<vmem>>, vector<1x64xf32>
        %58 = arith.mulf %45, %55 : vector<1x64xf32>
        %59 = arith.subf %57, %58 : vector<1x64xf32>
        %c0_42 = arith.constant 0 : index
        %c0_43 = arith.constant 0 : index
        %60 = vector.load %arg17[%c0_42, %c0_43] : memref<1x64xf32, #tpu.memory_space<vmem>>, vector<1x64xf32>
        tpu.vector_store %arg17[%c0_42, %c0_43], %59 {strides = array<i32>} : memref<1x64xf32, #tpu.memory_space<vmem>>, vector<1x64xf32>,
      } else {
      }
      %14 = arith.index_cast %1 : i32 to index
      %c0 = arith.constant 0 : index
      %15 = vector.load %arg20[%14, %c0] : memref<64x64xf32, #tpu.memory_space<vmem>>, vector<16x64xf32>
      %c0_5 = arith.constant 0 : index
      %c0_6 = arith.constant 0 : index
      %16 = vector.load %arg16[%c0_5, %c0_6] : memref<1x64xf32, #tpu.memory_space<vmem>>, vector<1x64xf32>
      %17 = vector.broadcast %16 : vector<1x64xf32> to vector<16x64xf32>
      %18 = arith.mulf %15, %17 : vector<16x64xf32>
      %c0_7 = arith.constant 0 : index
      %c0_8 = arith.constant 0 : index
      %19 = vector.load %arg17[%c0_7, %c0_8] : memref<1x64xf32, #tpu.memory_space<vmem>>, vector<1x64xf32>
      %20 = vector.broadcast %19 : vector<1x64xf32> to vector<16x64xf32>
      %21 = arith.addf %18, %20 : vector<16x64xf32>
      %cst = arith.constant 0.000000e+00 : f32
      %22 = vector.broadcast %cst : f32 to vector<16x64xf32>
      %23 = arith.maximumf %21, %22 : vector<16x64xf32>
      %c0_9 = arith.constant 0 : index
      %c0_10 = arith.constant 0 : index
      %24 = vector.load %arg6[%c0_9, %c0_10] : memref<64x64xf32, #tpu.memory_space<vmem>>, vector<64x64xf32>
      %cst_11 = arith.constant dense<0.000000e+00> : vector<16x64xf32>
      %25 = tpu.matmul %23, %24, %cst_11 {dimension_numbers = #tpu.dot_dimension_numbers<[1], [0], [0], [1], [0, 0, 1, 1], [], []>} : vector<16x64xf32>, vector<64x64xf32>, vector<16x64xf32> -> vector<16x64xf32>
      %26 = arith.index_cast %1 : i32 to index
      %c0_12 = arith.constant 0 : index
      %27 = vector.load %arg21[%26, %c0_12] : memref<64x64xf32, #tpu.memory_space<vmem>>, vector<16x64xf32>
      tpu.vector_store %arg21[%26, %c0_12], %25 {strides = array<i32>} : memref<64x64xf32, #tpu.memory_space<vmem>>, vector<16x64xf32>,
      %c0_13 = arith.constant 0 : index
      %c0_14 = arith.constant 0 : index
      %28 = vector.load %arg14[%c0_13, %c0_14] : memref<1x64xf32, #tpu.memory_space<vmem>>, vector<1x64xf32>
      %cst_15 = arith.constant dense<0.000000e+00> : vector<64xf32>
      %29 = vector.multi_reduction <add>, %25, %cst_15 [0] : vector<16x64xf32> to vector<64xf32>
      %30 = vector.shape_cast %29 : vector<64xf32> to vector<1x64xf32>
      %31 = arith.addf %28, %30 : vector<1x64xf32>
      %c0_16 = arith.constant 0 : index
      %c0_17 = arith.constant 0 : index
      %32 = vector.load %arg14[%c0_16, %c0_17] : memref<1x64xf32, #tpu.memory_space<vmem>>, vector<1x64xf32>
      tpu.vector_store %arg14[%c0_16, %c0_17], %31 {strides = array<i32>} : memref<1x64xf32, #tpu.memory_space<vmem>>, vector<1x64xf32>,
      %c0_18 = arith.constant 0 : index
      %c0_19 = arith.constant 0 : index
      %33 = vector.load %arg15[%c0_18, %c0_19] : memref<1x64xf32, #tpu.memory_space<vmem>>, vector<1x64xf32>
      %34 = arith.mulf %25, %25 : vector<16x64xf32>
      %cst_20 = arith.constant dense<0.000000e+00> : vector<64xf32>
      %35 = vector.multi_reduction <add>, %34, %cst_20 [0] : vector<16x64xf32> to vector<64xf32>
      %36 = vector.shape_cast %35 : vector<64xf32> to vector<1x64xf32>
      %37 = arith.addf %33, %36 : vector<1x64xf32>
      %c0_21 = arith.constant 0 : index
      %c0_22 = arith.constant 0 : index
      %38 = vector.load %arg15[%c0_21, %c0_22] : memref<1x64xf32, #tpu.memory_space<vmem>>, vector<1x64xf32>
      tpu.vector_store %arg15[%c0_21, %c0_22], %37 {strides = array<i32>} : memref<1x64xf32, #tpu.memory_space<vmem>>, vector<1x64xf32>,
    } else {
    }
    %c2_i32 = arith.constant 2 : i32
    %8 = arith.cmpi eq, %arg0, %c2_i32 : i32
    %9 = arith.extui %8 : i1 to i32
    %c0_i32_2 = arith.constant 0 : i32
    %10 = arith.cmpi ne, %9, %c0_i32_2 : i32
    scf.if %10 {
      %c0_i32_3 = arith.constant 0 : i32
      %11 = arith.cmpi eq, %arg1, %c0_i32_3 : i32
      %12 = arith.extui %11 : i1 to i32
      %c0_i32_4 = arith.constant 0 : i32
      %13 = arith.cmpi ne, %12, %c0_i32_4 : i32
      scf.if %13 {
        %c0_16 = arith.constant 0 : index
        %c0_17 = arith.constant 0 : index
        %30 = vector.load %arg14[%c0_16, %c0_17] : memref<1x64xf32, #tpu.memory_space<vmem>>, vector<1x64xf32>
        %cst_18 = arith.constant 1.562500e-02 : f32
        %31 = vector.broadcast %cst_18 : f32 to vector<1x64xf32>
        %32 = arith.mulf %30, %31 : vector<1x64xf32>
        %c0_19 = arith.constant 0 : index
        %c0_20 = arith.constant 0 : index
        %33 = vector.load %arg15[%c0_19, %c0_20] : memref<1x64xf32, #tpu.memory_space<vmem>>, vector<1x64xf32>
        %cst_21 = arith.constant 1.562500e-02 : f32
        %34 = vector.broadcast %cst_21 : f32 to vector<1x64xf32>
        %35 = arith.mulf %33, %34 : vector<1x64xf32>
        %36 = arith.mulf %32, %32 : vector<1x64xf32>
        %37 = arith.subf %35, %36 : vector<1x64xf32>
        %c0_22 = arith.constant 0 : index
        %c0_23 = arith.constant 0 : index
        %38 = vector.load %arg7[%c0_22, %c0_23] : memref<1x64xf32, #tpu.memory_space<vmem>>, vector<1x64xf32>
        %cst_24 = arith.constant 9.99999974E-6 : f32
        %39 = vector.broadcast %cst_24 : f32 to vector<1x64xf32>
        %40 = arith.addf %37, %39 : vector<1x64xf32>
        %41 = math.rsqrt %40 : vector<1x64xf32>
        %42 = arith.mulf %38, %41 : vector<1x64xf32>
        %c0_25 = arith.constant 0 : index
        %c0_26 = arith.constant 0 : index
        %43 = vector.load %arg18[%c0_25, %c0_26] : memref<1x64xf32, #tpu.memory_space<vmem>>, vector<1x64xf32>
        tpu.vector_store %arg18[%c0_25, %c0_26], %42 {strides = array<i32>} : memref<1x64xf32, #tpu.memory_space<vmem>>, vector<1x64xf32>,
        %c0_27 = arith.constant 0 : index
        %c0_28 = arith.constant 0 : index
        %44 = vector.load %arg8[%c0_27, %c0_28] : memref<1x64xf32, #tpu.memory_space<vmem>>, vector<1x64xf32>
        %45 = arith.mulf %32, %42 : vector<1x64xf32>
        %46 = arith.subf %44, %45 : vector<1x64xf32>
        %c0_29 = arith.constant 0 : index
        %c0_30 = arith.constant 0 : index
        %47 = vector.load %arg19[%c0_29, %c0_30] : memref<1x64xf32, #tpu.memory_space<vmem>>, vector<1x64xf32>
        tpu.vector_store %arg19[%c0_29, %c0_30], %46 {strides = array<i32>} : memref<1x64xf32, #tpu.memory_space<vmem>>, vector<1x64xf32>,
      } else {
      }
      %14 = arith.index_cast %1 : i32 to index
      %c0 = arith.constant 0 : index
      %15 = vector.load %arg21[%14, %c0] : memref<64x64xf32, #tpu.memory_space<vmem>>, vector<16x64xf32>
      %c0_5 = arith.constant 0 : index
      %c0_6 = arith.constant 0 : index
      %16 = vector.load %arg18[%c0_5, %c0_6] : memref<1x64xf32, #tpu.memory_space<vmem>>, vector<1x64xf32>
      %17 = vector.broadcast %16 : vector<1x64xf32> to vector<16x64xf32>
      %18 = arith.mulf %15, %17 : vector<16x64xf32>
      %c0_7 = arith.constant 0 : index
      %c0_8 = arith.constant 0 : index
      %19 = vector.load %arg19[%c0_7, %c0_8] : memref<1x64xf32, #tpu.memory_space<vmem>>, vector<1x64xf32>
      %20 = vector.broadcast %19 : vector<1x64xf32> to vector<16x64xf32>
      %21 = arith.addf %18, %20 : vector<16x64xf32>
      %cst = arith.constant 0.000000e+00 : f32
      %22 = vector.broadcast %cst : f32 to vector<16x64xf32>
      %23 = arith.maximumf %21, %22 : vector<16x64xf32>
      %c0_9 = arith.constant 0 : index
      %c0_10 = arith.constant 0 : index
      %24 = vector.load %arg9[%c0_9, %c0_10] : memref<64x16xf32, #tpu.memory_space<vmem>>, vector<64x16xf32>
      %cst_11 = arith.constant dense<0.000000e+00> : vector<16x16xf32>
      %25 = tpu.matmul %23, %24, %cst_11 {dimension_numbers = #tpu.dot_dimension_numbers<[1], [0], [0], [1], [0, 0, 1, 1], [], []>} : vector<16x64xf32>, vector<64x16xf32>, vector<16x16xf32> -> vector<16x16xf32>
      %c0_12 = arith.constant 0 : index
      %c0_13 = arith.constant 0 : index
      %26 = vector.load %arg10[%c0_12, %c0_13] : memref<1x16xf32, #tpu.memory_space<vmem>>, vector<1x16xf32>
      %27 = vector.broadcast %26 : vector<1x16xf32> to vector<16x16xf32>
      %28 = arith.addf %25, %27 : vector<16x16xf32>
      %c0_14 = arith.constant 0 : index
      %c0_15 = arith.constant 0 : index
      %29 = vector.load %arg11[%c0_14, %c0_15] : memref<16x16xf32, #tpu.memory_space<vmem>>, vector<16x16xf32>
      tpu.vector_store %arg11[%c0_14, %c0_15], %28 {strides = array<i32>} : memref<16x16xf32, #tpu.memory_space<vmem>>, vector<16x16xf32>,
    } else {
    }
    return
  }
  func.func @transform_0(%arg0: i32, %arg1: i32) -> (i32, i32) {
    %c0_i32 = arith.constant 0 : i32
    %0 = arith.cmpi eq, %arg0, %c0_i32 : i32
    %c0_i32_0 = arith.constant 0 : i32
    %1 = arith.select %0, %arg1, %c0_i32_0 : i32
    %c0_i32_1 = arith.constant 0 : i32
    %c0_i32_2 = arith.constant 0 : i32
    return %1, %c0_i32_1 : i32, i32
  }
  func.func @transform_1(%arg0: i32, %arg1: i32) -> (i32, i32) {
    %c0_i32 = arith.constant 0 : i32
    %c0_i32_0 = arith.constant 0 : i32
    %c0_i32_1 = arith.constant 0 : i32
    return %c0_i32, %c0_i32_0 : i32, i32
  }
  func.func @transform_2(%arg0: i32, %arg1: i32) -> (i32, i32) {
    %c0_i32 = arith.constant 0 : i32
    %c0_i32_0 = arith.constant 0 : i32
    %c0_i32_1 = arith.constant 0 : i32
    return %c0_i32, %c0_i32_0 : i32, i32
  }
  func.func @transform_3(%arg0: i32, %arg1: i32) -> (i32, i32) {
    %c0_i32 = arith.constant 0 : i32
    %c0_i32_0 = arith.constant 0 : i32
    %c0_i32_1 = arith.constant 0 : i32
    return %c0_i32, %c0_i32_0 : i32, i32
  }
  func.func @transform_4(%arg0: i32, %arg1: i32) -> (i32, i32) {
    %c0_i32 = arith.constant 0 : i32
    %c0_i32_0 = arith.constant 0 : i32
    %c0_i32_1 = arith.constant 0 : i32
    return %c0_i32, %c0_i32_0 : i32, i32
  }
  func.func @transform_5(%arg0: i32, %arg1: i32) -> (i32, i32) {
    %c0_i32 = arith.constant 0 : i32
    %c0_i32_0 = arith.constant 0 : i32
    %c0_i32_1 = arith.constant 0 : i32
    return %c0_i32, %c0_i32_0 : i32, i32
  }
  func.func @transform_6(%arg0: i32, %arg1: i32) -> (i32, i32) {
    %c0_i32 = arith.constant 0 : i32
    %c0_i32_0 = arith.constant 0 : i32
    %c0_i32_1 = arith.constant 0 : i32
    return %c0_i32, %c0_i32_0 : i32, i32
  }
  func.func @transform_7(%arg0: i32, %arg1: i32) -> (i32, i32) {
    %c0_i32 = arith.constant 0 : i32
    %c0_i32_0 = arith.constant 0 : i32
    %c0_i32_1 = arith.constant 0 : i32
    return %c0_i32, %c0_i32_0 : i32, i32
  }
  func.func @transform_8(%arg0: i32, %arg1: i32) -> (i32, i32) {
    %c0_i32 = arith.constant 0 : i32
    %c0_i32_0 = arith.constant 0 : i32
    %c0_i32_1 = arith.constant 0 : i32
    return %c0_i32, %c0_i32_0 : i32, i32
  }
  func.func @transform_9(%arg0: i32, %arg1: i32) -> (i32, i32) {
    %c2_i32 = arith.constant 2 : i32
    %0 = arith.cmpi eq, %arg0, %c2_i32 : i32
    %c0_i32 = arith.constant 0 : i32
    %1 = arith.select %0, %arg1, %c0_i32 : i32
    %c0_i32_0 = arith.constant 0 : i32
    %c0_i32_1 = arith.constant 0 : i32
    return %1, %c0_i32_0 : i32, i32
  }
}

module attributes {stable_mosaic.version = 11 : i64} {
  func.func @kernel(%arg0: i32, %arg1: i32, %arg2: memref<16x32xf32, #tpu.memory_space<vmem>>, %arg3: memref<32x64xf32, #tpu.memory_space<vmem>>, %arg4: memref<1x64xf32, #tpu.memory_space<vmem>>, %arg5: memref<1x64xf32, #tpu.memory_space<vmem>>, %arg6: memref<64x64xf32, #tpu.memory_space<vmem>>, %arg7: memref<1x64xf32, #tpu.memory_space<vmem>>, %arg8: memref<1x64xf32, #tpu.memory_space<vmem>>, %arg9: memref<64x16xf32, #tpu.memory_space<vmem>>, %arg10: memref<1x16xf32, #tpu.memory_space<vmem>>, %arg11: memref<16x16xf32, #tpu.memory_space<vmem>>, %arg12: memref<1x64xf32, #tpu.memory_space<vmem>>, %arg13: memref<1x64xf32, #tpu.memory_space<vmem>>, %arg14: memref<1x64xf32, #tpu.memory_space<vmem>>, %arg15: memref<1x64xf32, #tpu.memory_space<vmem>>, %arg16: memref<1x64xf32, #tpu.memory_space<vmem>>, %arg17: memref<1x64xf32, #tpu.memory_space<vmem>>, %arg18: memref<1x64xf32, #tpu.memory_space<vmem>>, %arg19: memref<1x64xf32, #tpu.memory_space<vmem>>, %arg20: memref<64x64xf32, #tpu.memory_space<vmem>>, %arg21: memref<64x64xf32, #tpu.memory_space<vmem>>) attributes {dimension_semantics = [#tpu.dimension_semantics<arbitrary>, #tpu.dimension_semantics<arbitrary>], iteration_bounds = array<i64: 3, 4>, scalar_prefetch = 0 : i64, scratch_operands = 10 : i64, tpu.core_type = #tpu.core_type<tc>, window_params = [{transform_indices = @transform_0, window_bounds = array<i64: 16, 32>}, {pipeline_mode = #tpu.pipeline_mode<synchronous>, transform_indices = @transform_1, window_bounds = array<i64: 32, 64>}, {pipeline_mode = #tpu.pipeline_mode<synchronous>, transform_indices = @transform_2, window_bounds = array<i64: 1, 64>}, {pipeline_mode = #tpu.pipeline_mode<synchronous>, transform_indices = @transform_3, window_bounds = array<i64: 1, 64>}, {pipeline_mode = #tpu.pipeline_mode<synchronous>, transform_indices = @transform_4, window_bounds = array<i64: 64, 64>}, {pipeline_mode = #tpu.pipeline_mode<synchronous>, transform_indices = @transform_5, window_bounds = array<i64: 1, 64>}, {pipeline_mode = #tpu.pipeline_mode<synchronous>, transform_indices = @transform_6, window_bounds = array<i64: 1, 64>}, {pipeline_mode = #tpu.pipeline_mode<synchronous>, transform_indices = @transform_7, window_bounds = array<i64: 64, 16>}, {pipeline_mode = #tpu.pipeline_mode<synchronous>, transform_indices = @transform_8, window_bounds = array<i64: 1, 16>}, {transform_indices = @transform_9, window_bounds = array<i64: 16, 16>}]} {
    %c16_i32 = arith.constant 16 : i32
    %0 = arith.muli %arg1, %c16_i32 : i32
    %1 = tpu.assume_multiple %0, 16 : i32
    %c0_i32 = arith.constant 0 : i32
    %2 = arith.cmpi eq, %arg0, %c0_i32 : i32
    %3 = arith.extui %2 : i1 to i32
    %c0_i32_0 = arith.constant 0 : i32
    %4 = arith.cmpi ne, %3, %c0_i32_0 : i32
    scf.if %4 {
      %c0_i32_3 = arith.constant 0 : i32
      %11 = arith.cmpi eq, %arg1, %c0_i32_3 : i32
      %12 = arith.extui %11 : i1 to i32
      %c0_i32_4 = arith.constant 0 : i32
      %13 = arith.cmpi ne, %12, %c0_i32_4 : i32
      scf.if %13 {
        %cst_19 = arith.constant 0.000000e+00 : f32
        %30 = vector.broadcast %cst_19 : f32 to vector<1x64xf32>
        %c0_20 = arith.constant 0 : index
        %c0_21 = arith.constant 0 : index
        %31 = vector.load %arg12[%c0_20, %c0_21] : memref<1x64xf32, #tpu.memory_space<vmem>>, vector<1x64xf32>
        tpu.vector_store %arg12[%c0_20, %c0_21], %30 {strides = array<i32>} : memref<1x64xf32, #tpu.memory_space<vmem>>, vector<1x64xf32>,
        %cst_22 = arith.constant 0.000000e+00 : f32
        %32 = vector.broadcast %cst_22 : f32 to vector<1x64xf32>
        %c0_23 = arith.constant 0 : index
        %c0_24 = arith.constant 0 : index
        %33 = vector.load %arg13[%c0_23, %c0_24] : memref<1x64xf32, #tpu.memory_space<vmem>>, vector<1x64xf32>
        tpu.vector_store %arg13[%c0_23, %c0_24], %32 {strides = array<i32>} : memref<1x64xf32, #tpu.memory_space<vmem>>, vector<1x64xf32>,
      } else {
      }
      %c0 = arith.constant 0 : index
      %c0_5 = arith.constant 0 : index
      %14 = vector.load %arg2[%c0, %c0_5] : memref<16x32xf32, #tpu.memory_space<vmem>>, vector<16x32xf32>
      %c0_6 = arith.constant 0 : index
      %c0_7 = arith.constant 0 : index
      %15 = vector.load %arg3[%c0_6, %c0_7] : memref<32x64xf32, #tpu.memory_space<vmem>>, vector<32x64xf32>
      %cst = arith.constant dense<0.000000e+00> : vector<16x64xf32>
      %16 = tpu.matmul %14, %15, %cst {dimension_numbers = #tpu.dot_dimension_numbers<[1], [0], [0], [1], [0, 0, 1, 1], [], []>} : vector<16x32xf32>, vector<32x64xf32>, vector<16x64xf32> -> vector<16x64xf32>
      %17 = arith.index_cast %1 : i32 to index
      %c0_8 = arith.constant 0 : index
      %18 = vector.load %arg20[%17, %c0_8] : memref<64x64xf32, #tpu.memory_space<vmem>>, vector<16x64xf32>
      tpu.vector_store %arg20[%17, %c0_8], %16 {strides = array<i32>} : memref<64x64xf32, #tpu.memory_space<vmem>>, vector<16x64xf32>,
      %c0_9 = arith.constant 0 : index
      %c0_10 = arith.constant 0 : index
      %19 = vector.load %arg12[%c0_9, %c0_10] : memref<1x64xf32, #tpu.memory_space<vmem>>, vector<1x64xf32>
      %cst_11 = arith.constant dense<0.000000e+00> : vector<64xf32>
      %20 = vector.multi_reduction <add>, %16, %cst_11 [0] : vector<16x64xf32> to vector<64xf32>
      %21 = vector.shape_cast %20 : vector<64xf32> to vector<1x64xf32>
      %22 = arith.addf %19, %21 : vector<1x64xf32>
      %c0_12 = arith.constant 0 : index
      %c0_13 = arith.constant 0 : index
      %23 = vector.load %arg12[%c0_12, %c0_13] : memref<1x64xf32, #tpu.memory_space<vmem>>, vector<1x64xf32>
      tpu.vector_store %arg12[%c0_12, %c0_13], %22 {strides = array<i32>} : memref<1x64xf32, #tpu.memory_space<vmem>>, vector<1x64xf32>,
      %c0_14 = arith.constant 0 : index
      %c0_15 = arith.constant 0 : index
      %24 = vector.load %arg13[%c0_14, %c0_15] : memref<1x64xf32, #tpu.memory_space<vmem>>, vector<1x64xf32>
      %25 = arith.mulf %16, %16 : vector<16x64xf32>
      %cst_16 = arith.constant dense<0.000000e+00> : vector<64xf32>
      %26 = vector.multi_reduction <add>, %25, %cst_16 [0] : vector<16x64xf32> to vector<64xf32>
      %27 = vector.shape_cast %26 : vector<64xf32> to vector<1x64xf32>
      %28 = arith.addf %24, %27 : vector<1x64xf32>
      %c0_17 = arith.constant 0 : index
      %c0_18 = arith.constant 0 : index
      %29 = vector.load %arg13[%c0_17, %c0_18] : memref<1x64xf32, #tpu.memory_space<vmem>>, vector<1x64xf32>
      tpu.vector_store %arg13[%c0_17, %c0_18], %28 {strides = array<i32>} : memref<1x64xf32, #tpu.memory_space<vmem>>, vector<1x64xf32>,
    } else {
    }
    %c1_i32 = arith.constant 1 : i32
    %5 = arith.cmpi eq, %arg0, %c1_i32 : i32
    %6 = arith.extui %5 : i1 to i32
    %c0_i32_1 = arith.constant 0 : i32
    %7 = arith.cmpi ne, %6, %c0_i32_1 : i32
    scf.if %7 {
      %c0_i32_3 = arith.constant 0 : i32
      %11 = arith.cmpi eq, %arg1, %c0_i32_3 : i32
      %12 = arith.extui %11 : i1 to i32
      %c0_i32_4 = arith.constant 0 : i32
      %13 = arith.cmpi ne, %12, %c0_i32_4 : i32
      scf.if %13 {
        %cst_23 = arith.constant 0.000000e+00 : f32
        %39 = vector.broadcast %cst_23 : f32 to vector<1x64xf32>
        %c0_24 = arith.constant 0 : index
        %c0_25 = arith.constant 0 : index
        %40 = vector.load %arg14[%c0_24, %c0_25] : memref<1x64xf32, #tpu.memory_space<vmem>>, vector<1x64xf32>
        tpu.vector_store %arg14[%c0_24, %c0_25], %39 {strides = array<i32>} : memref<1x64xf32, #tpu.memory_space<vmem>>, vector<1x64xf32>,
        %cst_26 = arith.constant 0.000000e+00 : f32
        %41 = vector.broadcast %cst_26 : f32 to vector<1x64xf32>
        %c0_27 = arith.constant 0 : index
        %c0_28 = arith.constant 0 : index
        %42 = vector.load %arg15[%c0_27, %c0_28] : memref<1x64xf32, #tpu.memory_space<vmem>>, vector<1x64xf32>
        tpu.vector_store %arg15[%c0_27, %c0_28], %41 {strides = array<i32>} : memref<1x64xf32, #tpu.memory_space<vmem>>, vector<1x64xf32>,
        %c0_29 = arith.constant 0 : index
        %c0_30 = arith.constant 0 : index
        %43 = vector.load %arg12[%c0_29, %c0_30] : memref<1x64xf32, #tpu.memory_space<vmem>>, vector<1x64xf32>
        %cst_31 = arith.constant 1.562500e-02 : f32
        %44 = vector.broadcast %cst_31 : f32 to vector<1x64xf32>
        %45 = arith.mulf %43, %44 : vector<1x64xf32>
        %c0_32 = arith.constant 0 : index
        %c0_33 = arith.constant 0 : index
        %46 = vector.load %arg13[%c0_32, %c0_33] : memref<1x64xf32, #tpu.memory_space<vmem>>, vector<1x64xf32>
        %cst_34 = arith.constant 1.562500e-02 : f32
        %47 = vector.broadcast %cst_34 : f32 to vector<1x64xf32>
        %48 = arith.mulf %46, %47 : vector<1x64xf32>
        %49 = arith.mulf %45, %45 : vector<1x64xf32>
        %50 = arith.subf %48, %49 : vector<1x64xf32>
        %c0_35 = arith.constant 0 : index
        %c0_36 = arith.constant 0 : index
        %51 = vector.load %arg4[%c0_35, %c0_36] : memref<1x64xf32, #tpu.memory_space<vmem>>, vector<1x64xf32>
        %cst_37 = arith.constant 9.99999974E-6 : f32
        %52 = vector.broadcast %cst_37 : f32 to vector<1x64xf32>
        %53 = arith.addf %50, %52 : vector<1x64xf32>
        %54 = math.rsqrt %53 : vector<1x64xf32>
        %55 = arith.mulf %51, %54 : vector<1x64xf32>
        %c0_38 = arith.constant 0 : index
        %c0_39 = arith.constant 0 : index
        %56 = vector.load %arg16[%c0_38, %c0_39] : memref<1x64xf32, #tpu.memory_space<vmem>>, vector<1x64xf32>
        tpu.vector_store %arg16[%c0_38, %c0_39], %55 {strides = array<i32>} : memref<1x64xf32, #tpu.memory_space<vmem>>, vector<1x64xf32>,
        %c0_40 = arith.constant 0 : index
        %c0_41 = arith.constant 0 : index
        %57 = vector.load %arg5[%c0_40, %c0_41] : memref<1x64xf32, #tpu.memory_space<vmem>>, vector<1x64xf32>
        %58 = arith.mulf %45, %55 : vector<1x64xf32>
        %59 = arith.subf %57, %58 : vector<1x64xf32>
        %c0_42 = arith.constant 0 : index
        %c0_43 = arith.constant 0 : index
        %60 = vector.load %arg17[%c0_42, %c0_43] : memref<1x64xf32, #tpu.memory_space<vmem>>, vector<1x64xf32>
        tpu.vector_store %arg17[%c0_42, %c0_43], %59 {strides = array<i32>} : memref<1x64xf32, #tpu.memory_space<vmem>>, vector<1x64xf32>,
      } else {
      }
      %14 = arith.index_cast %1 : i32 to index
      %c0 = arith.constant 0 : index
      %15 = vector.load %arg20[%14, %c0] : memref<64x64xf32, #tpu.memory_space<vmem>>, vector<16x64xf32>
      %c0_5 = arith.constant 0 : index
      %c0_6 = arith.constant 0 : index
      %16 = vector.load %arg16[%c0_5, %c0_6] : memref<1x64xf32, #tpu.memory_space<vmem>>, vector<1x64xf32>
      %17 = vector.broadcast %16 : vector<1x64xf32> to vector<16x64xf32>
      %18 = arith.mulf %15, %17 : vector<16x64xf32>
      %c0_7 = arith.constant 0 : index
      %c0_8 = arith.constant 0 : index
      %19 = vector.load %arg17[%c0_7, %c0_8] : memref<1x64xf32, #tpu.memory_space<vmem>>, vector<1x64xf32>
      %20 = vector.broadcast %19 : vector<1x64xf32> to vector<16x64xf32>
      %21 = arith.addf %18, %20 : vector<16x64xf32>
      %cst = arith.constant 0.000000e+00 : f32
      %22 = vector.broadcast %cst : f32 to vector<16x64xf32>
      %23 = arith.maximumf %21, %22 : vector<16x64xf32>
      %c0_9 = arith.constant 0 : index
      %c0_10 = arith.constant 0 : index
      %24 = vector.load %arg6[%c0_9, %c0_10] : memref<64x64xf32, #tpu.memory_space<vmem>>, vector<64x64xf32>
      %cst_11 = arith.constant dense<0.000000e+00> : vector<16x64xf32>
      %25 = tpu.matmul %23, %24, %cst_11 {dimension_numbers = #tpu.dot_dimension_numbers<[1], [0], [0], [1], [0, 0, 1, 1], [], []>} : vector<16x64xf32>, vector<64x64xf32>, vector<16x64xf32> -> vector<16x64xf32>
      %26 = arith.index_cast %1 : i32 to index
      %c0_12 = arith.constant 0 : index
      %27 = vector.load %arg21[%26, %c0_12] : memref<64x64xf32, #tpu.memory_space<vmem>>, vector<16x64xf32>
      tpu.vector_store %arg21[%26, %c0_12], %25 {strides = array<i32>} : memref<64x64xf32, #tpu.memory_space<vmem>>, vector<16x64xf32>,
      %c0_13 = arith.constant 0 : index
      %c0_14 = arith.constant 0 : index
      %28 = vector.load %arg14[%c0_13, %c0_14] : memref<1x64xf32, #tpu.memory_space<vmem>>, vector<1x64xf32>
      %cst_15 = arith.constant dense<0.000000e+00> : vector<64xf32>
      %29 = vector.multi_reduction <add>, %25, %cst_15 [0] : vector<16x64xf32> to vector<64xf32>
      %30 = vector.shape_cast %29 : vector<64xf32> to vector<1x64xf32>
      %31 = arith.addf %28, %30 : vector<1x64xf32>
      %c0_16 = arith.constant 0 : index
      %c0_17 = arith.constant 0 : index
      %32 = vector.load %arg14[%c0_16, %c0_17] : memref<1x64xf32, #tpu.memory_space<vmem>>, vector<1x64xf32>
      tpu.vector_store %arg14[%c0_16, %c0_17], %31 {strides = array<i32>} : memref<1x64xf32, #tpu.memory_space<vmem>>, vector<1x64xf32>,
      %c0_18 = arith.constant 0 : index
      %c0_19 = arith.constant 0 : index
      %33 = vector.load %arg15[%c0_18, %c0_19] : memref<1x64xf32, #tpu.memory_space<vmem>>, vector<1x64xf32>
      %34 = arith.mulf %25, %25 : vector<16x64xf32>
      %cst_20 = arith.constant dense<0.000000e+00> : vector<64xf32>
      %35 = vector.multi_reduction <add>, %34, %cst_20 [0] : vector<16x64xf32> to vector<64xf32>
      %36 = vector.shape_cast %35 : vector<64xf32> to vector<1x64xf32>
      %37 = arith.addf %33, %36 : vector<1x64xf32>
      %c0_21 = arith.constant 0 : index
      %c0_22 = arith.constant 0 : index
      %38 = vector.load %arg15[%c0_21, %c0_22] : memref<1x64xf32, #tpu.memory_space<vmem>>, vector<1x64xf32>
      tpu.vector_store %arg15[%c0_21, %c0_22], %37 {strides = array<i32>} : memref<1x64xf32, #tpu.memory_space<vmem>>, vector<1x64xf32>,
    } else {
    }
    %c2_i32 = arith.constant 2 : i32
    %8 = arith.cmpi eq, %arg0, %c2_i32 : i32
    %9 = arith.extui %8 : i1 to i32
    %c0_i32_2 = arith.constant 0 : i32
    %10 = arith.cmpi ne, %9, %c0_i32_2 : i32
    scf.if %10 {
      %c0_i32_3 = arith.constant 0 : i32
      %11 = arith.cmpi eq, %arg1, %c0_i32_3 : i32
      %12 = arith.extui %11 : i1 to i32
      %c0_i32_4 = arith.constant 0 : i32
      %13 = arith.cmpi ne, %12, %c0_i32_4 : i32
      scf.if %13 {
        %c0_16 = arith.constant 0 : index
        %c0_17 = arith.constant 0 : index
        %30 = vector.load %arg14[%c0_16, %c0_17] : memref<1x64xf32, #tpu.memory_space<vmem>>, vector<1x64xf32>
        %cst_18 = arith.constant 1.562500e-02 : f32
        %31 = vector.broadcast %cst_18 : f32 to vector<1x64xf32>
        %32 = arith.mulf %30, %31 : vector<1x64xf32>
        %c0_19 = arith.constant 0 : index
        %c0_20 = arith.constant 0 : index
        %33 = vector.load %arg15[%c0_19, %c0_20] : memref<1x64xf32, #tpu.memory_space<vmem>>, vector<1x64xf32>
        %cst_21 = arith.constant 1.562500e-02 : f32
        %34 = vector.broadcast %cst_21 : f32 to vector<1x64xf32>
        %35 = arith.mulf %33, %34 : vector<1x64xf32>
        %36 = arith.mulf %32, %32 : vector<1x64xf32>
        %37 = arith.subf %35, %36 : vector<1x64xf32>
        %c0_22 = arith.constant 0 : index
        %c0_23 = arith.constant 0 : index
        %38 = vector.load %arg7[%c0_22, %c0_23] : memref<1x64xf32, #tpu.memory_space<vmem>>, vector<1x64xf32>
        %cst_24 = arith.constant 9.99999974E-6 : f32
        %39 = vector.broadcast %cst_24 : f32 to vector<1x64xf32>
        %40 = arith.addf %37, %39 : vector<1x64xf32>
        %41 = math.rsqrt %40 : vector<1x64xf32>
        %42 = arith.mulf %38, %41 : vector<1x64xf32>
        %c0_25 = arith.constant 0 : index
        %c0_26 = arith.constant 0 : index
        %43 = vector.load %arg18[%c0_25, %c0_26] : memref<1x64xf32, #tpu.memory_space<vmem>>, vector<1x64xf32>
        tpu.vector_store %arg18[%c0_25, %c0_26], %42 {strides = array<i32>} : memref<1x64xf32, #tpu.memory_space<vmem>>, vector<1x64xf32>,
        %c0_27 = arith.constant 0 : index
        %c0_28 = arith.constant 0 : index
        %44 = vector.load %arg8[%c0_27, %c0_28] : memref<1x64xf32, #tpu.memory_space<vmem>>, vector<1x64xf32>
        %45 = arith.mulf %32, %42 : vector<1x64xf32>
        %46 = arith.subf %44, %45 : vector<1x64xf32>
        %c0_29 = arith.constant 0 : index
        %c0_30 = arith.constant 0 : index
        %47 = vector.load %arg19[%c0_29, %c0_30] : memref<1x64xf32, #tpu.memory_space<vmem>>, vector<1x64xf32>
        tpu.vector_store %arg19[%c0_29, %c0_30], %46 {strides = array<i32>} : memref<1x64xf32, #tpu.memory_space<vmem>>, vector<1x64xf32>,
      } else {
      }
      %14 = arith.index_cast %1 : i32 to index
      %c0 = arith.constant 0 : index
      %15 = vector.load %arg21[%14, %c0] : memref<64x64xf32, #tpu.memory_space<vmem>>, vector<16x64xf32>
      %c0_5 = arith.constant 0 : index
      %c0_6 = arith.constant 0 : index
      %16 = vector.load %arg18[%c0_5, %c0_6] : memref<1x64xf32, #tpu.memory_space<vmem>>, vector<1x64xf32>
      %17 = vector.broadcast %16 : vector<1x64xf32> to vector<16x64xf32>
      %18 = arith.mulf %15, %17 : vector<16x64xf32>
      %c0_7 = arith.constant 0 : index
      %c0_8 = arith.constant 0 : index
      %19 = vector.load %arg19[%c0_7, %c0_8] : memref<1x64xf32, #tpu.memory_space<vmem>>, vector<1x64xf32>
      %20 = vector.broadcast %19 : vector<1x64xf32> to vector<16x64xf32>
      %21 = arith.addf %18, %20 : vector<16x64xf32>
      %cst = arith.constant 0.000000e+00 : f32
      %22 = vector.broadcast %cst : f32 to vector<16x64xf32>
      %23 = arith.maximumf %21, %22 : vector<16x64xf32>
      %c0_9 = arith.constant 0 : index
      %c0_10 = arith.constant 0 : index
      %24 = vector.load %arg9[%c0_9, %c0_10] : memref<64x16xf32, #tpu.memory_space<vmem>>, vector<64x16xf32>
      %cst_11 = arith.constant dense<0.000000e+00> : vector<16x16xf32>
      %25 = tpu.matmul %23, %24, %cst_11 {dimension_numbers = #tpu.dot_dimension_numbers<[1], [0], [0], [1], [0, 0, 1, 1], [], []>} : vector<16x64xf32>, vector<64x16xf32>, vector<16x16xf32> -> vector<16x16xf32>
      %c0_12 = arith.constant 0 : index
      %c0_13 = arith.constant 0 : index
      %26 = vector.load %arg10[%c0_12, %c0_13] : memref<1x16xf32, #tpu.memory_space<vmem>>, vector<1x16xf32>
      %27 = vector.broadcast %26 : vector<1x16xf32> to vector<16x16xf32>
      %28 = arith.addf %25, %27 : vector<16x16xf32>
      %c0_14 = arith.constant 0 : index
      %c0_15 = arith.constant 0 : index
      %29 = vector.load %arg11[%c0_14, %c0_15] : memref<16x16xf32, #tpu.memory_space<vmem>>, vector<16x16xf32>
      tpu.vector_store %arg11[%c0_14, %c0_15], %28 {strides = array<i32>} : memref<16x16xf32, #tpu.memory_space<vmem>>, vector<16x16xf32>,
    } else {
    }
    return
  }
  func.func @transform_0(%arg0: i32, %arg1: i32) -> (i32, i32) {
    %c0_i32 = arith.constant 0 : i32
    %0 = arith.cmpi eq, %arg0, %c0_i32 : i32
    %c0_i32_0 = arith.constant 0 : i32
    %1 = arith.select %0, %arg1, %c0_i32_0 : i32
    %c0_i32_1 = arith.constant 0 : i32
    %c0_i32_2 = arith.constant 0 : i32
    return %1, %c0_i32_1 : i32, i32
  }
  func.func @transform_1(%arg0: i32, %arg1: i32) -> (i32, i32) {
    %c0_i32 = arith.constant 0 : i32
    %c0_i32_0 = arith.constant 0 : i32
    %c0_i32_1 = arith.constant 0 : i32
    return %c0_i32, %c0_i32_0 : i32, i32
  }
  func.func @transform_2(%arg0: i32, %arg1: i32) -> (i32, i32) {
    %c0_i32 = arith.constant 0 : i32
    %c0_i32_0 = arith.constant 0 : i32
    %c0_i32_1 = arith.constant 0 : i32
    return %c0_i32, %c0_i32_0 : i32, i32
  }
  func.func @transform_3(%arg0: i32, %arg1: i32) -> (i32, i32) {
    %c0_i32 = arith.constant 0 : i32
    %c0_i32_0 = arith.constant 0 : i32
    %c0_i32_1 = arith.constant 0 : i32
    return %c0_i32, %c0_i32_0 : i32, i32
  }
  func.func @transform_4(%arg0: i32, %arg1: i32) -> (i32, i32) {
    %c0_i32 = arith.constant 0 : i32
    %c0_i32_0 = arith.constant 0 : i32
    %c0_i32_1 = arith.constant 0 : i32
    return %c0_i32, %c0_i32_0 : i32, i32
  }
  func.func @transform_5(%arg0: i32, %arg1: i32) -> (i32, i32) {
    %c0_i32 = arith.constant 0 : i32
    %c0_i32_0 = arith.constant 0 : i32
    %c0_i32_1 = arith.constant 0 : i32
    return %c0_i32, %c0_i32_0 : i32, i32
  }
  func.func @transform_6(%arg0: i32, %arg1: i32) -> (i32, i32) {
    %c0_i32 = arith.constant 0 : i32
    %c0_i32_0 = arith.constant 0 : i32
    %c0_i32_1 = arith.constant 0 : i32
    return %c0_i32, %c0_i32_0 : i32, i32
  }
  func.func @transform_7(%arg0: i32, %arg1: i32) -> (i32, i32) {
    %c0_i32 = arith.constant 0 : i32
    %c0_i32_0 = arith.constant 0 : i32
    %c0_i32_1 = arith.constant 0 : i32
    return %c0_i32, %c0_i32_0 : i32, i32
  }
  func.func @transform_8(%arg0: i32, %arg1: i32) -> (i32, i32) {
    %c0_i32 = arith.constant 0 : i32
    %c0_i32_0 = arith.constant 0 : i32
    %c0_i32_1 = arith.constant 0 : i32
    return %c0_i32, %c0_i32_0 : i32, i32
  }
  func.func @transform_9(%arg0: i32, %arg1: i32) -> (i32, i32) {
    %c2_i32 = arith.constant 2 : i32
    %0 = arith.cmpi eq, %arg0, %c2_i32 : i32
    %c0_i32 = arith.constant 0 : i32
    %1 = arith.select %0, %arg1, %c0_i32 : i32
    %c0_i32_0 = arith.constant 0 : i32
    %c0_i32_1 = arith.constant 0 : i32
    return %1, %c0_i32_0 : i32, i32
  }
}

</mosaic_0001>

<bundles_post_ra>
// kernel: tpu_custom_call.1
= control target key start
LH: loop header
LB: loop body
LE: loop exit
PB: predicated region body
PF: predicated region fallthrough
CT: control target
= control target key end

     0   :  { %s1143_s30 = smov 0   ;;  %s1145_s10 = smov 0   ;;  %s1308_s0 = inlined_call_operand.vmem [shape: f32[64,32], index: 0, kind: input, shape index: {}]   ;;  %s1309_s1 = inlined_call_operand.vmem [shape: f32[32,64], index: 1, kind: input, shape index: {}]   ;;  %s1310_s2 = inlined_call_operand.vmem [shape: f32[1,64], index: 2, kind: input, shape index: {}]   ;;  %s1311_s3 = inlined_call_operand.vmem [shape: f32[1,64], index: 3, kind: input, shape index: {}]   ;;  %s1312_s4 = inlined_call_operand.vmem [shape: f32[64,64], index: 4, kind: input, shape index: {}]   ;;  %s1313_s5 = inlined_call_operand.vmem [shape: f32[1,64], index: 5, kind: input, shape index: {}]   ;;  %s1314_s6 = inlined_call_operand.vmem [shape: f32[1,64], index: 6, kind: input, shape index: {}]   ;;  %s1315_s7 = inlined_call_operand.vmem [shape: f32[64,16], index: 7, kind: input, shape index: {}]   ;;  %s1316_s8 = inlined_call_operand.vmem [shape: f32[1,16], index: 8, kind: input, shape index: {}]   ;;  %s1317_s9 = inlined_call_operand.vmem [shape: f32[64,16], index: 9, kind: output, shape index: {}]  }
   0x1   :  { %s1147_s11 = smov 0   ;;  %s1149_s12 = smov 0  }
   0x2   :  { %s1151_s13 = smov 0  }
   0x3 LB: > { %s28_s14 = sadd.s32 1, %s1081_s11  ;;  %s31_s15 = sadd.s32 1, %s1085_s12  ;;  %s1089_s13 = sphi %s1151_s13, %s19_s13   ;;  %s1085_s12 = sphi %s1149_s12, %s1321_s12   ;;  %s1081_s11 = sphi %s1147_s11, %s1320_s11   ;;  %s1077_s10 = sphi %s1145_s10, %s1319_s10   ;;  %s1073_s30 = sphi %s1143_s30, %s1318_s30  }
   0x4   : > { %p29_p0 = scmp.ge.s32.totalorder %s28_s14, 4  ;;  %p905_p1 = scmp.ge.s32.totalorder %s1089_s13, 1 }
   0x5   : > { %p312_p2 = scmp.lt.s32.totalorder %s1089_s13, 13 }
   0x6   : > { %s1323_s14 = smov (%p29_p0, %s28_s14), 0  ;;  %s1325_s15 = smov (!%p29_p0, %s31_s15), %s1085_s12 }
   0x7   : > { %p313_p3 = pnand %p905_p1, %p312_p2  ;;  %p33_p4 = scmp.ge.s32.totalorder %s1325_s15, 3 }
   0x8   : > { %p352_p5 = scmp.eq.s32.totalorder (!%p313_p3), %s1077_s10, 0  ;;  %p362_p6 = scmp.eq.s32.totalorder (!%p313_p3), %s1077_s10, 2 }
   0x9   : > { %s1327_s15 = smov (%p33_p4, %s1325_s15), 0  ;;  %316 = sbr.rel (%p313_p3) target bundleno = 785 (0x311), region = 56 }
   0xa   : > { %s1180_s16 = sshll.u32 (!%p313_p3), %s1073_s30, 4  ;;  %p911_p9 = scmp.ne.s32.totalorder (!%p313_p3), %s1077_s10, 0 }
   0xe   : > { %s353_s17 = scalar_select %p352_p5, %s1073_s30, 0 }
   0xf   : > { %s363_s18 = scalar_select %p362_p6, %s1073_s30, 0 }
  0x10   : > { %s906_s19 = sshll.u32 %s353_s17, 1  ;;  %p912_p10 = scmp.ne.s32.totalorder (!%p911_p9), %s1073_s30, 0 }
  0x11   : > { %p355_p7 = scmp.lt.s32.totalorder %s906_s19, 7  ;;  %s908_s20 = sshll.u32 %s363_s18, 1 }
  0x12   : > { %p365_p8 = scmp.lt.s32.totalorder %s908_s20, 7  ;;  %376 = sbr.rel (%p911_p9) target bundleno = 254 (0xfe), region = 60 }
  0x13   : > { %s1329_s19 = smov (!%p355_p7, %s906_s19), 7 }
  0x14   : > { %s1331_s20 = smov (!%p365_p8, %s908_s20), 7  ;;  %s907_s21 = sshll.u32 %s1329_s19, 3 }
  0x15   : > { %s358_s24 = scalar_lea.vmem %s1308_s0, %s907_s21  ;;  %s909_s25 = sshll.u32 %s1331_s20, 3 }
  0x16   : > { %s1190_s28 = scalar_lea.vmem %s1317_s9, %s909_s25 }
  0x17   : > { %380 = sbr.rel (%p912_p10) target bundleno = 30 (0x1e), region = 64 }
  0x1c   : > { %vm381_vm0 = vcmask 516096   ;;  %v1091_v0 = vmov 0.0  }
  0x1d   : > { %382 = vst.msk [vmem:[#allocation2] sm:$0x1] %vm381_vm0, %v1091_v0  ;;  %383 = vst.msk [vmem:[#allocation3] sm:$0x1] %vm381_vm0, %v1091_v0 }
  0x1e PF: > { %v389_v1 = vld [vmem:[%s1309_s1 + $0x18] sm:$0xff]  ;;  %v388_v2 = vld [vmem:[%s1309_s1 + $0x10] sm:$0xff]  ;;  %vm390_vm1 = vcmask 261120   ;;  %v384_v3 = vld [vmem:[%s358_s24] sm:$0xff]  ;;  %vm473_vm2 = vcmask 523264   ;;  %s472_s25 = scalar_lea.vmem [#allocation10], %s1180_s16 }
  0x1f   : > { %956 = vmatprep.subr.mxu0 %v389_v1  ;;  %v387_v4 = vld [vmem:[%s1309_s1 + $0x8] sm:$0xff]  ;;  %964 = vmatprep.mubr.msk.f32.mxu0 %vm390_vm1, %v384_v3  ;;  %v386_v5 = vld [vmem:[%s1309_s1] sm:$0xff]  ;;  %vm487_vm3 = vcmask 516096  }
  0x20   : > { %957 = vmatpush3.msra.mxu0 %v389_v1  ;;  %v385_v6 = vld [vmem:[%s358_s24 + $0x8] sm:$0xff] }
  0x21   : > { %958 = vmatprep.subr.mxu0 %v388_v2 }
  0x22   : > { %959 = vmatpush3.msra.mxu0 %v388_v2 }
  0x23   : > { %960 = vmatprep.subr.mxu0 %v387_v4 }
  0x24   : > { %961 = vmatpush3.msra.mxu0 %v387_v4  ;;  %v476_v26 = vld [vmem:[#allocation2] sm:$0x1]  ;;  %v489_v29 = vld [vmem:[#allocation3] sm:$0x1] }
  0x25   : > { %962 = vmatprep.subr.mxu0 %v386_v5 }
  0x26   : > { %963 = vmatpush3.msra.mxu0 %v386_v5 }
  0x27   : > { %965 = vmatmul.mubr.msk.f32.vlgmr.msra.gmra.mxu0 %vm390_vm1, %v385_v6 }
  0xe7   : > { %v966_v7 = vpop.f32.mrf.mxu0 }
  0xe8   : > { %475 = vst.msk [vmem:[%s472_s25 + $0x8] sm:$0xff] %vm473_vm2, %v966_v7  ;;  %v491_v8 = vmul.f32 %v966_v7, %v966_v7  ;;  %v478_v10 = vsel %vm473_vm2, %v966_v7, 0.0 }
  0xe9   : > { %v463_v9 = vpop.f32.mrf.mxu0 }
  0xea   : > { %474 = vst.msk [vmem:[%s472_s25] sm:$0xff] %vm473_vm2, %v463_v9  ;;  %v477_v11 = vsel %vm473_vm2, %v463_v9, 0.0  ;;  %v490_v12 = vmul.f32 %v463_v9, %v463_v9  ;;  %v493_v14 = vsel %vm473_vm2, %v491_v8, 0.0 }
  0xeb   : > { %v479_v13 = vadd.f32 %v478_v10, %v477_v11 }
  0xec   : > { %v492_v15 = vsel %vm473_vm2, %v490_v12, 0.0 }
  0xed   : > { %v480_v16 = vrot.slane %v479_v13, 4  ;;  %v494_v17 = vadd.f32 %v493_v14, %v492_v15 }
  0xef   : > { %v481_v18 = vadd.f32 %v480_v16, %v479_v13  ;;  %v495_v19 = vrot.slane %v494_v17, 4 }
  0xf1   : > { %v482_v20 = vrot.slane %v481_v18, 2  ;;  %v496_v21 = vadd.f32 %v495_v19, %v494_v17 }
  0xf3   : > { %v483_v22 = vadd.f32 %v482_v20, %v481_v18  ;;  %v497_v23 = vrot.slane %v496_v21, 2 }
  0xf5   : > { %v484_v24 = vrot.slane %v483_v22, 1  ;;  %v498_v25 = vadd.f32 %v497_v23, %v496_v21 }
  0xf7   : > { %v485_v27 = vadd.f32 %v484_v24, %v483_v22  ;;  %v499_v28 = vrot.slane %v498_v25, 1 }
  0xf9   : > { %v486_v30 = vadd.f32 %v485_v27, %v476_v26  ;;  %v500_v31 = vadd.f32 %v499_v28, %v498_v25 }
  0xfb   : > { %488 = vst.msk [vmem:[#allocation2] sm:$0x1] %vm487_vm3, %v486_v30  ;;  %v501_v32 = vadd.f32 %v500_v31, %v489_v29 }
  0xfd   : > { %502 = vst.msk [vmem:[#allocation3] sm:$0x1] %vm487_vm3, %v501_v32 }
  0xfe PF: > { %p915_p11 = scmp.ne.s32.totalorder %s1077_s10, 1 }
  0xff   : > { %p916_p12 = scmp.ne.s32.totalorder (!%p915_p11), %s1073_s30, 0 }
 0x100   : > { %506 = sbr.rel (%p915_p11) target bundleno = 528 (0x210), region = 68 }
 0x105   : > { %510 = sbr.rel (%p916_p12) target bundleno = 296 (0x128), region = 72 }
 0x10a   : > { %vm511_vm4 = vcmask 516096   ;;  %v514_v33 = vld [vmem:[#allocation2] sm:$0x1]  ;;  %v516_v34 = vld [vmem:[#allocation3] sm:$0x1]  ;;  %v1092_v35 = vmov 0.0  }
 0x10b   : > { %512 = vst.msk [vmem:[#allocation4] sm:$0x1] %vm511_vm4, %v1092_v35  ;;  %513 = vst.msk [vmem:[#allocation5] sm:$0x1] %vm511_vm4, %v1092_v35  ;;  %v515_v36 = vmul.f32 0.015625, %v514_v33  ;;  %v517_v37 = vmul.f32 0.015625, %v516_v34 }
 0x10c   : > { %v520_v41 = vld [vmem:[%s1310_s2] sm:$0x1] }
 0x10d   : > { %v518_v38 = vmul.f32 %v515_v36, %v515_v36  ;;  %v525_v44 = vld [vmem:[%s1311_s3] sm:$0x1] }
 0x10f   : > { %v519_v39 = vsub.f32 %v517_v37, %v518_v38 }
 0x111   : > { %v521_v40 = vadd.f32 1e-05, %v519_v39 }
 0x113   : > { %1047 = vrsqrt.f32 %v521_v40 }
 0x120   : > { %v1048_v42 = vpop.eup %1047 }
 0x121   : > { %v523_v43 = vmul.f32 %v1048_v42, %v520_v41 }
 0x123   : > { %524 = vst.msk [vmem:[#allocation6] sm:$0x1] %vm511_vm4, %v523_v43  ;;  %v526_v45 = vmul.f32 %v523_v43, %v515_v36 }
 0x125   : > { %v527_v46 = vsub.f32 %v525_v44, %v526_v45 }
 0x127   : > { %528 = vst.msk [vmem:[#allocation7] sm:$0x1] %vm511_vm4, %v527_v46 }
 0x128 PF: > { %v559_v47 = vld [vmem:[%s1312_s4 + $0x38] sm:$0xff]  ;;  %v558_v48 = vld [vmem:[%s1312_s4 + $0x30] sm:$0xff]  ;;  %v557_v49 = vld [vmem:[%s1312_s4 + $0x28] sm:$0xff]  ;;  %s529_s23 = scalar_lea.vmem [#allocation10], %s1180_s16  ;;  %vm560_vm5 = vcmask 523264   ;;  %s642_s22 = scalar_lea.vmem [#allocation11], %s1180_s16 }
 0x129   : > { %967 = vmatprep.subr.mxu0 %v559_v47  ;;  %v530_v50 = vld [vmem:[%s529_s23] sm:$0xff]  ;;  %v531_v51 = vld [vmem:[%s529_s23 + $0x8] sm:$0xff]  ;;  %v555_v57 = vld [vmem:[%s1312_s4 + $0x18] sm:$0xff]  ;;  %vm656_vm6 = vcmask 516096  }
 0x12a   : > { %968 = vmatpush3.msra.mxu0 %v559_v47  ;;  %v917_v52 = vld [vmem:[#allocation6] ss:$0 sm:$0xff]  ;;  %v554_v59 = vld [vmem:[%s1312_s4 + $0x10] sm:$0xff]  ;;  %v553_v62 = vld [vmem:[%s1312_s4 + $0x8] sm:$0xff] }
 0x12b   : > { %969 = vmatprep.subr.mxu0 %v558_v48  ;;  %v556_v54 = vld [vmem:[%s1312_s4 + $0x20] sm:$0xff]  ;;  %v539_v55 = vmul.f32 %v917_v52, %v530_v50  ;;  %v540_v56 = vmul.f32 %v917_v52, %v531_v51 }
 0x12c   : > { %970 = vmatpush3.msra.mxu0 %v558_v48  ;;  %v552_v63 = vld [vmem:[%s1312_s4] sm:$0xff] }
 0x12d   : > { %971 = vmatprep.subr.mxu0 %v557_v49  ;;  %v645_v20 = vld [vmem:[#allocation4] sm:$0x1]  ;;  %v658_v23 = vld [vmem:[#allocation5] sm:$0x1] }
 0x12e   : > { %v918_v53 = vld [vmem:[#allocation7] ss:$0 sm:$0xff]  ;;  %972 = vmatpush3.msra.mxu0 %v557_v49 }
 0x12f   : > { %v548_v58 = vadd.f32 %v918_v53, %v539_v55  ;;  %973 = vmatprep.subr.mxu0 %v556_v54  ;;  %v549_v61 = vadd.f32 %v918_v53, %v540_v56 }
 0x130   : > { %974 = vmatpush3.msra.mxu0 %v556_v54 }
 0x131   : > { %v550_v60 = vmax.f32 %v548_v58, 0.0  ;;  %975 = vmatprep.subr.mxu0 %v555_v57  ;;  %v551_v0 = vmax.f32 %v549_v61, 0.0 }
 0x132   : > { %976 = vmatpush3.msra.mxu0 %v555_v57 }
 0x133   : > { %983 = vmatprep.mubr.msk.f32.mxu0 %vm560_vm5, %v550_v60  ;;  %977 = vmatprep.subr.mxu0 %v554_v59 }
 0x134   : > { %978 = vmatpush3.msra.mxu0 %v554_v59 }
 0x135   : > { %979 = vmatprep.subr.mxu0 %v553_v62 }
 0x136   : > { %980 = vmatpush3.msra.mxu0 %v553_v62 }
 0x137   : > { %981 = vmatprep.subr.mxu0 %v552_v63 }
 0x138   : > { %982 = vmatpush3.msra.mxu0 %v552_v63 }
 0x139   : > { %984 = vmatmul.mubr.msk.f32.vlgmr.msra.gmra.mxu0 %vm560_vm5, %v551_v0 }
 0x1f9   : > { %v985_v1 = vpop.f32.mrf.mxu0 }
 0x1fa   : > { %644 = vst.msk [vmem:[%s642_s22 + $0x8] sm:$0xff] %vm560_vm5, %v985_v1  ;;  %v660_v2 = vmul.f32 %v985_v1, %v985_v1  ;;  %v647_v4 = vsel %vm560_vm5, %v985_v1, 0.0 }
 0x1fb   : > { %v633_v3 = vpop.f32.mrf.mxu0 }
 0x1fc   : > { %643 = vst.msk [vmem:[%s642_s22] sm:$0xff] %vm560_vm5, %v633_v3  ;;  %v646_v5 = vsel %vm560_vm5, %v633_v3, 0.0  ;;  %v659_v6 = vmul.f32 %v633_v3, %v633_v3  ;;  %v662_v8 = vsel %vm560_vm5, %v660_v2, 0.0 }
 0x1fd   : > { %v648_v7 = vadd.f32 %v647_v4, %v646_v5 }
 0x1fe   : > { %v661_v9 = vsel %vm560_vm5, %v659_v6, 0.0 }
 0x1ff   : > { %v649_v10 = vrot.slane %v648_v7, 4  ;;  %v663_v11 = vadd.f32 %v662_v8, %v661_v9 }
 0x201   : > { %v650_v12 = vadd.f32 %v649_v10, %v648_v7  ;;  %v664_v13 = vrot.slane %v663_v11, 4 }
 0x203   : > { %v651_v14 = vrot.slane %v650_v12, 2  ;;  %v665_v15 = vadd.f32 %v664_v13, %v663_v11 }
 0x205   : > { %v652_v16 = vadd.f32 %v651_v14, %v650_v12  ;;  %v666_v17 = vrot.slane %v665_v15, 2 }
 0x207   : > { %v653_v18 = vrot.slane %v652_v16, 1  ;;  %v667_v19 = vadd.f32 %v666_v17, %v665_v15 }
 0x209   : > { %v654_v21 = vadd.f32 %v653_v18, %v652_v16  ;;  %v668_v22 = vrot.slane %v667_v19, 1 }
 0x20b   : > { %v655_v24 = vadd.f32 %v654_v21, %v645_v20  ;;  %v669_v25 = vadd.f32 %v668_v22, %v667_v19 }
 0x20d   : > { %657 = vst.msk [vmem:[#allocation4] sm:$0x1] %vm656_vm6, %v655_v24  ;;  %v670_v26 = vadd.f32 %v669_v25, %v658_v23 }
 0x20f   : > { %671 = vst.msk [vmem:[#allocation5] sm:$0x1] %vm656_vm6, %v670_v26 }
 0x210 PF: > { %p921_p13 = scmp.ne.s32.totalorder %s1077_s10, 2 }
 0x211   : > { %p922_p0 = scmp.ne.s32.totalorder (!%p921_p13), %s1073_s30, 0 }
 0x212   : > { %675 = sbr.rel (%p921_p13) target bundleno = 785 (0x311), region = 76 }
 0x217   : > { %679 = sbr.rel (%p922_p0) target bundleno = 570 (0x23a), region = 80 }
 0x21c   : > { %v680_v27 = vld [vmem:[#allocation4] sm:$0x1]  ;;  %v682_v28 = vld [vmem:[#allocation5] sm:$0x1]  ;;  %v686_v34 = vld [vmem:[%s1313_s5] sm:$0x1] }
 0x21d   : > { %v681_v29 = vmul.f32 0.015625, %v680_v27  ;;  %v683_v30 = vmul.f32 0.015625, %v682_v28  ;;  %vm690_vm7 = vcmask 516096   ;;  %v692_v37 = vld [vmem:[%s1314_s6] sm:$0x1] }
 0x21f   : > { %v684_v31 = vmul.f32 %v681_v29, %v681_v29 }
 0x221   : > { %v685_v32 = vsub.f32 %v683_v30, %v684_v31 }
 0x223   : > { %v687_v33 = vadd.f32 1e-05, %v685_v32 }
 0x225   : > { %1049 = vrsqrt.f32 %v687_v33 }
 0x232   : > { %v1050_v35 = vpop.eup %1049 }
 0x233   : > { %v689_v36 = vmul.f32 %v1050_v35, %v686_v34 }
 0x235   : > { %691 = vst.msk [vmem:[#allocation8] sm:$0x1] %vm690_vm7, %v689_v36  ;;  %v693_v38 = vmul.f32 %v689_v36, %v681_v29 }
 0x237   : > { %v694_v39 = vsub.f32 %v692_v37, %v693_v38 }
 0x239   : > { %695 = vst.msk [vmem:[#allocation9] sm:$0x1] %vm690_vm7, %v694_v39 }
 0x23a PF: > { %v726_v40 = vld [vmem:[%s1315_s7 + $0x38] sm:$0xff]  ;;  %v725_v41 = vld [vmem:[%s1315_s7 + $0x30] sm:$0xff]  ;;  %v724_v42 = vld [vmem:[%s1315_s7 + $0x28] sm:$0xff]  ;;  %s696_s19 = scalar_lea.vmem [#allocation11], %s1180_s16  ;;  %vm734_vm8 = vcmask 523264   ;;  %vm816_vm9 = vcmask 130048  }
 0x23b   : > { %986 = vmatprep.subr.mxu0 %v726_v40  ;;  %v697_v43 = vld [vmem:[%s696_s19] sm:$0xff]  ;;  %v698_v44 = vld [vmem:[%s696_s19 + $0x8] sm:$0xff]  ;;  %v722_v50 = vld [vmem:[%s1315_s7 + $0x18] sm:$0xff] }
 0x23c   : > { %987 = vmatpush3.msra.mxu0 %v726_v40  ;;  %v923_v45 = vld [vmem:[#allocation8] ss:$0 sm:$0xff]  ;;  %v721_v52 = vld [vmem:[%s1315_s7 + $0x10] sm:$0xff]  ;;  %v720_v55 = vld [vmem:[%s1315_s7 + $0x8] sm:$0xff] }
 0x23d   : > { %988 = vmatprep.subr.mxu0 %v725_v41  ;;  %v723_v47 = vld [vmem:[%s1315_s7 + $0x20] sm:$0xff]  ;;  %v706_v48 = vmul.f32 %v923_v45, %v697_v43  ;;  %v707_v49 = vmul.f32 %v923_v45, %v698_v44 }
 0x23e   : > { %989 = vmatpush3.msra.mxu0 %v725_v41  ;;  %v719_v56 = vld [vmem:[%s1315_s7] sm:$0xff] }
 0x23f   : > { %990 = vmatprep.subr.mxu0 %v724_v42  ;;  %v925_v59 = vld [vmem:[%s1316_s8] ss:$0 sm:$0xff] }
 0x240   : > { %v924_v46 = vld [vmem:[#allocation9] ss:$0 sm:$0xff]  ;;  %991 = vmatpush3.msra.mxu0 %v724_v42 }
 0x241   : > { %v715_v51 = vadd.f32 %v924_v46, %v706_v48  ;;  %992 = vmatprep.subr.mxu0 %v723_v47  ;;  %v716_v54 = vadd.f32 %v924_v46, %v707_v49 }
 0x242   : > { %993 = vmatpush3.msra.mxu0 %v723_v47 }
 0x243   : > { %v717_v53 = vmax.f32 %v715_v51, 0.0  ;;  %994 = vmatprep.subr.mxu0 %v722_v50  ;;  %v718_v57 = vmax.f32 %v716_v54, 0.0 }
 0x244   : > { %995 = vmatpush3.msra.mxu0 %v722_v50 }
 0x245   : > { %1002 = vmatprep.mubr.msk.f32.mxu0 %vm734_vm8, %v717_v53  ;;  %996 = vmatprep.subr.mxu0 %v721_v52 }
 0x246   : > { %997 = vmatpush3.msra.mxu0 %v721_v52 }
 0x247   : > { %998 = vmatprep.subr.mxu0 %v720_v55 }
 0x248   : > { %999 = vmatpush3.msra.mxu0 %v720_v55 }
 0x249   : > { %1000 = vmatprep.subr.mxu0 %v719_v56 }
 0x24a   : > { %1001 = vmatpush3.msra.mxu0 %v719_v56 }
 0x24b   : > { %1003 = vmatmul.mubr.msk.f32.vlgmr.msra.gmra.mxu0 %vm734_vm8, %v718_v57 }
 0x30b   : > { %v1004_v58 = vpop.f32.mrf.mxu0 }
 0x30c   : > { %v813_v62 = vadd.f32 %v1004_v58, %v925_v59 }
 0x30d   : > { %v807_v60 = vpop.f32.mrf.mxu0 }
 0x30e   : > { %v808_v61 = vadd.f32 %v925_v59, %v807_v60  ;;  %818 = vst.msk [vmem:[%s1190_s28 + $0x8] sm:$0xff] %vm816_vm9, %v813_v62 }
 0x310   : > { %817 = vst.msk [vmem:[%s1190_s28] sm:$0xff] %vm816_vm9, %v808_v61 }
 0x311 PF: > { %s19_s13 = sadd.s32 1, %s1089_s13   ;;  %s1318_s30 = smov %s1081_s11 }
 0x312   : > { %p16_p1 = scmp.ge.s32.totalorder %s19_s13, 14   ;;  %s1319_s10 = smov %s1085_s12 }
 0x313   : > { %s1320_s11 = smov %s1323_s14  ;;  %s1321_s12 = smov %s1327_s15 }
 0x314   :  { %18 = sbr.rel (!%p16_p1) target bundleno = 3 (0x3), region = 114 }

// kernel: tpu_custom_call.1
= control target key start
LH: loop header
LB: loop body
LE: loop exit
PB: predicated region body
PF: predicated region fallthrough
CT: control target
= control target key end

     0   :  { %s1143_s30 = smov 0   ;;  %s1145_s10 = smov 0   ;;  %s1308_s0 = inlined_call_operand.vmem [shape: f32[64,32], index: 0, kind: input, shape index: {}]   ;;  %s1309_s1 = inlined_call_operand.vmem [shape: f32[32,64], index: 1, kind: input, shape index: {}]   ;;  %s1310_s2 = inlined_call_operand.vmem [shape: f32[1,64], index: 2, kind: input, shape index: {}]   ;;  %s1311_s3 = inlined_call_operand.vmem [shape: f32[1,64], index: 3, kind: input, shape index: {}]   ;;  %s1312_s4 = inlined_call_operand.vmem [shape: f32[64,64], index: 4, kind: input, shape index: {}]   ;;  %s1313_s5 = inlined_call_operand.vmem [shape: f32[1,64], index: 5, kind: input, shape index: {}]   ;;  %s1314_s6 = inlined_call_operand.vmem [shape: f32[1,64], index: 6, kind: input, shape index: {}]   ;;  %s1315_s7 = inlined_call_operand.vmem [shape: f32[64,16], index: 7, kind: input, shape index: {}]   ;;  %s1316_s8 = inlined_call_operand.vmem [shape: f32[1,16], index: 8, kind: input, shape index: {}]   ;;  %s1317_s9 = inlined_call_operand.vmem [shape: f32[64,16], index: 9, kind: output, shape index: {}]  }
   0x1   :  { %s1147_s11 = smov 0   ;;  %s1149_s12 = smov 0  }
   0x2   :  { %s1151_s13 = smov 0  }
   0x3 LB: > { %s28_s14 = sadd.s32 1, %s1081_s11  ;;  %s31_s15 = sadd.s32 1, %s1085_s12  ;;  %s1089_s13 = sphi %s1151_s13, %s19_s13   ;;  %s1085_s12 = sphi %s1149_s12, %s1321_s12   ;;  %s1081_s11 = sphi %s1147_s11, %s1320_s11   ;;  %s1077_s10 = sphi %s1145_s10, %s1319_s10   ;;  %s1073_s30 = sphi %s1143_s30, %s1318_s30  }
   0x4   : > { %p29_p0 = scmp.ge.s32.totalorder %s28_s14, 4  ;;  %p905_p1 = scmp.ge.s32.totalorder %s1089_s13, 1 }
   0x5   : > { %p312_p2 = scmp.lt.s32.totalorder %s1089_s13, 13 }
   0x6   : > { %s1323_s14 = smov (%p29_p0, %s28_s14), 0  ;;  %s1325_s15 = smov (!%p29_p0, %s31_s15), %s1085_s12 }
   0x7   : > { %p313_p3 = pnand %p905_p1, %p312_p2  ;;  %p33_p4 = scmp.ge.s32.totalorder %s1325_s15, 3 }
   0x8   : > { %p352_p5 = scmp.eq.s32.totalorder (!%p313_p3), %s1077_s10, 0  ;;  %p362_p6 = scmp.eq.s32.totalorder (!%p313_p3), %s1077_s10, 2 }
   0x9   : > { %s1327_s15 = smov (%p33_p4, %s1325_s15), 0  ;;  %316 = sbr.rel (%p313_p3) target bundleno = 785 (0x311), region = 56 }
   0xa   : > { %s1180_s16 = sshll.u32 (!%p313_p3), %s1073_s30, 4  ;;  %p911_p9 = scmp.ne.s32.totalorder (!%p313_p3), %s1077_s10, 0 }
   0xe   : > { %s353_s17 = scalar_select %p352_p5, %s1073_s30, 0 }
   0xf   : > { %s363_s18 = scalar_select %p362_p6, %s1073_s30, 0 }
  0x10   : > { %s906_s19 = sshll.u32 %s353_s17, 1  ;;  %p912_p10 = scmp.ne.s32.totalorder (!%p911_p9), %s1073_s30, 0 }
  0x11   : > { %p355_p7 = scmp.lt.s32.totalorder %s906_s19, 7  ;;  %s908_s20 = sshll.u32 %s363_s18, 1 }
  0x12   : > { %p365_p8 = scmp.lt.s32.totalorder %s908_s20, 7  ;;  %376 = sbr.rel (%p911_p9) target bundleno = 254 (0xfe), region = 60 }
  0x13   : > { %s1329_s19 = smov (!%p355_p7, %s906_s19), 7 }
  0x14   : > { %s1331_s20 = smov (!%p365_p8, %s908_s20), 7  ;;  %s907_s21 = sshll.u32 %s1329_s19, 3 }
  0x15   : > { %s358_s24 = scalar_lea.vmem %s1308_s0, %s907_s21  ;;  %s909_s25 = sshll.u32 %s1331_s20, 3 }
  0x16   : > { %s1190_s28 = scalar_lea.vmem %s1317_s9, %s909_s25 }
  0x17   : > { %380 = sbr.rel (%p912_p10) target bundleno = 30 (0x1e), region = 64 }
  0x1c   : > { %vm381_vm0 = vcmask 516096   ;;  %v1091_v0 = vmov 0.0  }
  0x1d   : > { %382 = vst.msk [vmem:[#allocation2] sm:$0x1] %vm381_vm0, %v1091_v0  ;;  %383 = vst.msk [vmem:[#allocation3] sm:$0x1] %vm381_vm0, %v1091_v0 }
  0x1e PF: > { %v389_v1 = vld [vmem:[%s1309_s1 + $0x18] sm:$0xff]  ;;  %v388_v2 = vld [vmem:[%s1309_s1 + $0x10] sm:$0xff]  ;;  %vm390_vm1 = vcmask 261120   ;;  %v384_v3 = vld [vmem:[%s358_s24] sm:$0xff]  ;;  %vm473_vm2 = vcmask 523264   ;;  %s472_s25 = scalar_lea.vmem [#allocation10], %s1180_s16 }
  0x1f   : > { %956 = vmatprep.subr.mxu0 %v389_v1  ;;  %v387_v4 = vld [vmem:[%s1309_s1 + $0x8] sm:$0xff]  ;;  %964 = vmatprep.mubr.msk.f32.mxu0 %vm390_vm1, %v384_v3  ;;  %v386_v5 = vld [vmem:[%s1309_s1] sm:$0xff]  ;;  %vm487_vm3 = vcmask 516096  }
  0x20   : > { %957 = vmatpush3.msra.mxu0 %v389_v1  ;;  %v385_v6 = vld [vmem:[%s358_s24 + $0x8] sm:$0xff] }
  0x21   : > { %958 = vmatprep.subr.mxu0 %v388_v2 }
  0x22   : > { %959 = vmatpush3.msra.mxu0 %v388_v2 }
  0x23   : > { %960 = vmatprep.subr.mxu0 %v387_v4 }
  0x24   : > { %961 = vmatpush3.msra.mxu0 %v387_v4  ;;  %v476_v26 = vld [vmem:[#allocation2] sm:$0x1]  ;;  %v489_v29 = vld [vmem:[#allocation3] sm:$0x1] }
  0x25   : > { %962 = vmatprep.subr.mxu0 %v386_v5 }
  0x26   : > { %963 = vmatpush3.msra.mxu0 %v386_v5 }
  0x27   : > { %965 = vmatmul.mubr.msk.f32.vlgmr.msra.gmra.mxu0 %vm390_vm1, %v385_v6 }
  0xe7   : > { %v966_v7 = vpop.f32.mrf.mxu0 }
  0xe8   : > { %475 = vst.msk [vmem:[%s472_s25 + $0x8] sm:$0xff] %vm473_vm2, %v966_v7  ;;  %v491_v8 = vmul.f32 %v966_v7, %v966_v7  ;;  %v478_v10 = vsel %vm473_vm2, %v966_v7, 0.0 }
  0xe9   : > { %v463_v9 = vpop.f32.mrf.mxu0 }
  0xea   : > { %474 = vst.msk [vmem:[%s472_s25] sm:$0xff] %vm473_vm2, %v463_v9  ;;  %v477_v11 = vsel %vm473_vm2, %v463_v9, 0.0  ;;  %v490_v12 = vmul.f32 %v463_v9, %v463_v9  ;;  %v493_v14 = vsel %vm473_vm2, %v491_v8, 0.0 }
  0xeb   : > { %v479_v13 = vadd.f32 %v478_v10, %v477_v11 }
  0xec   : > { %v492_v15 = vsel %vm473_vm2, %v490_v12, 0.0 }
  0xed   : > { %v480_v16 = vrot.slane %v479_v13, 4  ;;  %v494_v17 = vadd.f32 %v493_v14, %v492_v15 }
  0xef   : > { %v481_v18 = vadd.f32 %v480_v16, %v479_v13  ;;  %v495_v19 = vrot.slane %v494_v17, 4 }
  0xf1   : > { %v482_v20 = vrot.slane %v481_v18, 2  ;;  %v496_v21 = vadd.f32 %v495_v19, %v494_v17 }
  0xf3   : > { %v483_v22 = vadd.f32 %v482_v20, %v481_v18  ;;  %v497_v23 = vrot.slane %v496_v21, 2 }
  0xf5   : > { %v484_v24 = vrot.slane %v483_v22, 1  ;;  %v498_v25 = vadd.f32 %v497_v23, %v496_v21 }
  0xf7   : > { %v485_v27 = vadd.f32 %v484_v24, %v483_v22  ;;  %v499_v28 = vrot.slane %v498_v25, 1 }
  0xf9   : > { %v486_v30 = vadd.f32 %v485_v27, %v476_v26  ;;  %v500_v31 = vadd.f32 %v499_v28, %v498_v25 }
  0xfb   : > { %488 = vst.msk [vmem:[#allocation2] sm:$0x1] %vm487_vm3, %v486_v30  ;;  %v501_v32 = vadd.f32 %v500_v31, %v489_v29 }
  0xfd   : > { %502 = vst.msk [vmem:[#allocation3] sm:$0x1] %vm487_vm3, %v501_v32 }
  0xfe PF: > { %p915_p11 = scmp.ne.s32.totalorder %s1077_s10, 1 }
  0xff   : > { %p916_p12 = scmp.ne.s32.totalorder (!%p915_p11), %s1073_s30, 0 }
 0x100   : > { %506 = sbr.rel (%p915_p11) target bundleno = 528 (0x210), region = 68 }
 0x105   : > { %510 = sbr.rel (%p916_p12) target bundleno = 296 (0x128), region = 72 }
 0x10a   : > { %vm511_vm4 = vcmask 516096   ;;  %v514_v33 = vld [vmem:[#allocation2] sm:$0x1]  ;;  %v516_v34 = vld [vmem:[#allocation3] sm:$0x1]  ;;  %v1092_v35 = vmov 0.0  }
 0x10b   : > { %512 = vst.msk [vmem:[#allocation4] sm:$0x1] %vm511_vm4, %v1092_v35  ;;  %513 = vst.msk [vmem:[#allocation5] sm:$0x1] %vm511_vm4, %v1092_v35  ;;  %v515_v36 = vmul.f32 0.015625, %v514_v33  ;;  %v517_v37 = vmul.f32 0.015625, %v516_v34 }
 0x10c   : > { %v520_v41 = vld [vmem:[%s1310_s2] sm:$0x1] }
 0x10d   : > { %v518_v38 = vmul.f32 %v515_v36, %v515_v36  ;;  %v525_v44 = vld [vmem:[%s1311_s3] sm:$0x1] }
 0x10f   : > { %v519_v39 = vsub.f32 %v517_v37, %v518_v38 }
 0x111   : > { %v521_v40 = vadd.f32 1e-05, %v519_v39 }
 0x113   : > { %1047 = vrsqrt.f32 %v521_v40 }
 0x120   : > { %v1048_v42 = vpop.eup %1047 }
 0x121   : > { %v523_v43 = vmul.f32 %v1048_v42, %v520_v41 }
 0x123   : > { %524 = vst.msk [vmem:[#allocation6] sm:$0x1] %vm511_vm4, %v523_v43  ;;  %v526_v45 = vmul.f32 %v523_v43, %v515_v36 }
 0x125   : > { %v527_v46 = vsub.f32 %v525_v44, %v526_v45 }
 0x127   : > { %528 = vst.msk [vmem:[#allocation7] sm:$0x1] %vm511_vm4, %v527_v46 }
 0x128 PF: > { %v559_v47 = vld [vmem:[%s1312_s4 + $0x38] sm:$0xff]  ;;  %v558_v48 = vld [vmem:[%s1312_s4 + $0x30] sm:$0xff]  ;;  %v557_v49 = vld [vmem:[%s1312_s4 + $0x28] sm:$0xff]  ;;  %s529_s23 = scalar_lea.vmem [#allocation10], %s1180_s16  ;;  %vm560_vm5 = vcmask 523264   ;;  %s642_s22 = scalar_lea.vmem [#allocation11], %s1180_s16 }
 0x129   : > { %967 = vmatprep.subr.mxu0 %v559_v47  ;;  %v530_v50 = vld [vmem:[%s529_s23] sm:$0xff]  ;;  %v531_v51 = vld [vmem:[%s529_s23 + $0x8] sm:$0xff]  ;;  %v555_v57 = vld [vmem:[%s1312_s4 + $0x18] sm:$0xff]  ;;  %vm656_vm6 = vcmask 516096  }
 0x12a   : > { %968 = vmatpush3.msra.mxu0 %v559_v47  ;;  %v917_v52 = vld [vmem:[#allocation6] ss:$0 sm:$0xff]  ;;  %v554_v59 = vld [vmem:[%s1312_s4 + $0x10] sm:$0xff]  ;;  %v553_v62 = vld [vmem:[%s1312_s4 + $0x8] sm:$0xff] }
 0x12b   : > { %969 = vmatprep.subr.mxu0 %v558_v48  ;;  %v556_v54 = vld [vmem:[%s1312_s4 + $0x20] sm:$0xff]  ;;  %v539_v55 = vmul.f32 %v917_v52, %v530_v50  ;;  %v540_v56 = vmul.f32 %v917_v52, %v531_v51 }
 0x12c   : > { %970 = vmatpush3.msra.mxu0 %v558_v48  ;;  %v552_v63 = vld [vmem:[%s1312_s4] sm:$0xff] }
 0x12d   : > { %971 = vmatprep.subr.mxu0 %v557_v49  ;;  %v645_v20 = vld [vmem:[#allocation4] sm:$0x1]  ;;  %v658_v23 = vld [vmem:[#allocation5] sm:$0x1] }
 0x12e   : > { %v918_v53 = vld [vmem:[#allocation7] ss:$0 sm:$0xff]  ;;  %972 = vmatpush3.msra.mxu0 %v557_v49 }
 0x12f   : > { %v548_v58 = vadd.f32 %v918_v53, %v539_v55  ;;  %973 = vmatprep.subr.mxu0 %v556_v54  ;;  %v549_v61 = vadd.f32 %v918_v53, %v540_v56 }
 0x130   : > { %974 = vmatpush3.msra.mxu0 %v556_v54 }
 0x131   : > { %v550_v60 = vmax.f32 %v548_v58, 0.0  ;;  %975 = vmatprep.subr.mxu0 %v555_v57  ;;  %v551_v0 = vmax.f32 %v549_v61, 0.0 }
 0x132   : > { %976 = vmatpush3.msra.mxu0 %v555_v57 }
 0x133   : > { %983 = vmatprep.mubr.msk.f32.mxu0 %vm560_vm5, %v550_v60  ;;  %977 = vmatprep.subr.mxu0 %v554_v59 }
 0x134   : > { %978 = vmatpush3.msra.mxu0 %v554_v59 }
 0x135   : > { %979 = vmatprep.subr.mxu0 %v553_v62 }
 0x136   : > { %980 = vmatpush3.msra.mxu0 %v553_v62 }
 0x137   : > { %981 = vmatprep.subr.mxu0 %v552_v63 }
 0x138   : > { %982 = vmatpush3.msra.mxu0 %v552_v63 }
 0x139   : > { %984 = vmatmul.mubr.msk.f32.vlgmr.msra.gmra.mxu0 %vm560_vm5, %v551_v0 }
 0x1f9   : > { %v985_v1 = vpop.f32.mrf.mxu0 }
 0x1fa   : > { %644 = vst.msk [vmem:[%s642_s22 + $0x8] sm:$0xff] %vm560_vm5, %v985_v1  ;;  %v660_v2 = vmul.f32 %v985_v1, %v985_v1  ;;  %v647_v4 = vsel %vm560_vm5, %v985_v1, 0.0 }
 0x1fb   : > { %v633_v3 = vpop.f32.mrf.mxu0 }
 0x1fc   : > { %643 = vst.msk [vmem:[%s642_s22] sm:$0xff] %vm560_vm5, %v633_v3  ;;  %v646_v5 = vsel %vm560_vm5, %v633_v3, 0.0  ;;  %v659_v6 = vmul.f32 %v633_v3, %v633_v3  ;;  %v662_v8 = vsel %vm560_vm5, %v660_v2, 0.0 }
 0x1fd   : > { %v648_v7 = vadd.f32 %v647_v4, %v646_v5 }
 0x1fe   : > { %v661_v9 = vsel %vm560_vm5, %v659_v6, 0.0 }
 0x1ff   : > { %v649_v10 = vrot.slane %v648_v7, 4  ;;  %v663_v11 = vadd.f32 %v662_v8, %v661_v9 }
 0x201   : > { %v650_v12 = vadd.f32 %v649_v10, %v648_v7  ;;  %v664_v13 = vrot.slane %v663_v11, 4 }
 0x203   : > { %v651_v14 = vrot.slane %v650_v12, 2  ;;  %v665_v15 = vadd.f32 %v664_v13, %v663_v11 }
 0x205   : > { %v652_v16 = vadd.f32 %v651_v14, %v650_v12  ;;  %v666_v17 = vrot.slane %v665_v15, 2 }
 0x207   : > { %v653_v18 = vrot.slane %v652_v16, 1  ;;  %v667_v19 = vadd.f32 %v666_v17, %v665_v15 }
 0x209   : > { %v654_v21 = vadd.f32 %v653_v18, %v652_v16  ;;  %v668_v22 = vrot.slane %v667_v19, 1 }
 0x20b   : > { %v655_v24 = vadd.f32 %v654_v21, %v645_v20  ;;  %v669_v25 = vadd.f32 %v668_v22, %v667_v19 }
 0x20d   : > { %657 = vst.msk [vmem:[#allocation4] sm:$0x1] %vm656_vm6, %v655_v24  ;;  %v670_v26 = vadd.f32 %v669_v25, %v658_v23 }
 0x20f   : > { %671 = vst.msk [vmem:[#allocation5] sm:$0x1] %vm656_vm6, %v670_v26 }
 0x210 PF: > { %p921_p13 = scmp.ne.s32.totalorder %s1077_s10, 2 }
 0x211   : > { %p922_p0 = scmp.ne.s32.totalorder (!%p921_p13), %s1073_s30, 0 }
 0x212   : > { %675 = sbr.rel (%p921_p13) target bundleno = 785 (0x311), region = 76 }
 0x217   : > { %679 = sbr.rel (%p922_p0) target bundleno = 570 (0x23a), region = 80 }
 0x21c   : > { %v680_v27 = vld [vmem:[#allocation4] sm:$0x1]  ;;  %v682_v28 = vld [vmem:[#allocation5] sm:$0x1]  ;;  %v686_v34 = vld [vmem:[%s1313_s5] sm:$0x1] }
 0x21d   : > { %v681_v29 = vmul.f32 0.015625, %v680_v27  ;;  %v683_v30 = vmul.f32 0.015625, %v682_v28  ;;  %vm690_vm7 = vcmask 516096   ;;  %v692_v37 = vld [vmem:[%s1314_s6] sm:$0x1] }
 0x21f   : > { %v684_v31 = vmul.f32 %v681_v29, %v681_v29 }
 0x221   : > { %v685_v32 = vsub.f32 %v683_v30, %v684_v31 }
 0x223   : > { %v687_v33 = vadd.f32 1e-05, %v685_v32 }
 0x225   : > { %1049 = vrsqrt.f32 %v687_v33 }
 0x232   : > { %v1050_v35 = vpop.eup %1049 }
 0x233   : > { %v689_v36 = vmul.f32 %v1050_v35, %v686_v34 }
 0x235   : > { %691 = vst.msk [vmem:[#allocation8] sm:$0x1] %vm690_vm7, %v689_v36  ;;  %v693_v38 = vmul.f32 %v689_v36, %v681_v29 }
 0x237   : > { %v694_v39 = vsub.f32 %v692_v37, %v693_v38 }
 0x239   : > { %695 = vst.msk [vmem:[#allocation9] sm:$0x1] %vm690_vm7, %v694_v39 }
 0x23a PF: > { %v726_v40 = vld [vmem:[%s1315_s7 + $0x38] sm:$0xff]  ;;  %v725_v41 = vld [vmem:[%s1315_s7 + $0x30] sm:$0xff]  ;;  %v724_v42 = vld [vmem:[%s1315_s7 + $0x28] sm:$0xff]  ;;  %s696_s19 = scalar_lea.vmem [#allocation11], %s1180_s16  ;;  %vm734_vm8 = vcmask 523264   ;;  %vm816_vm9 = vcmask 130048  }
 0x23b   : > { %986 = vmatprep.subr.mxu0 %v726_v40  ;;  %v697_v43 = vld [vmem:[%s696_s19] sm:$0xff]  ;;  %v698_v44 = vld [vmem:[%s696_s19 + $0x8] sm:$0xff]  ;;  %v722_v50 = vld [vmem:[%s1315_s7 + $0x18] sm:$0xff] }
 0x23c   : > { %987 = vmatpush3.msra.mxu0 %v726_v40  ;;  %v923_v45 = vld [vmem:[#allocation8] ss:$0 sm:$0xff]  ;;  %v721_v52 = vld [vmem:[%s1315_s7 + $0x10] sm:$0xff]  ;;  %v720_v55 = vld [vmem:[%s1315_s7 + $0x8] sm:$0xff] }
 0x23d   : > { %988 = vmatprep.subr.mxu0 %v725_v41  ;;  %v723_v47 = vld [vmem:[%s1315_s7 + $0x20] sm:$0xff]  ;;  %v706_v48 = vmul.f32 %v923_v45, %v697_v43  ;;  %v707_v49 = vmul.f32 %v923_v45, %v698_v44 }
 0x23e   : > { %989 = vmatpush3.msra.mxu0 %v725_v41  ;;  %v719_v56 = vld [vmem:[%s1315_s7] sm:$0xff] }
 0x23f   : > { %990 = vmatprep.subr.mxu0 %v724_v42  ;;  %v925_v59 = vld [vmem:[%s1316_s8] ss:$0 sm:$0xff] }
 0x240   : > { %v924_v46 = vld [vmem:[#allocation9] ss:$0 sm:$0xff]  ;;  %991 = vmatpush3.msra.mxu0 %v724_v42 }
 0x241   : > { %v715_v51 = vadd.f32 %v924_v46, %v706_v48  ;;  %992 = vmatprep.subr.mxu0 %v723_v47  ;;  %v716_v54 = vadd.f32 %v924_v46, %v707_v49 }
 0x242   : > { %993 = vmatpush3.msra.mxu0 %v723_v47 }
 0x243   : > { %v717_v53 = vmax.f32 %v715_v51, 0.0  ;;  %994 = vmatprep.subr.mxu0 %v722_v50  ;;  %v718_v57 = vmax.f32 %v716_v54, 0.0 }
 0x244   : > { %995 = vmatpush3.msra.mxu0 %v722_v50 }
 0x245   : > { %1002 = vmatprep.mubr.msk.f32.mxu0 %vm734_vm8, %v717_v53  ;;  %996 = vmatprep.subr.mxu0 %v721_v52 }
 0x246   : > { %997 = vmatpush3.msra.mxu0 %v721_v52 }
 0x247   : > { %998 = vmatprep.subr.mxu0 %v720_v55 }
 0x248   : > { %999 = vmatpush3.msra.mxu0 %v720_v55 }
 0x249   : > { %1000 = vmatprep.subr.mxu0 %v719_v56 }
 0x24a   : > { %1001 = vmatpush3.msra.mxu0 %v719_v56 }
 0x24b   : > { %1003 = vmatmul.mubr.msk.f32.vlgmr.msra.gmra.mxu0 %vm734_vm8, %v718_v57 }
 0x30b   : > { %v1004_v58 = vpop.f32.mrf.mxu0 }
 0x30c   : > { %v813_v62 = vadd.f32 %v1004_v58, %v925_v59 }
 0x30d   : > { %v807_v60 = vpop.f32.mrf.mxu0 }
 0x30e   : > { %v808_v61 = vadd.f32 %v925_v59, %v807_v60  ;;  %818 = vst.msk [vmem:[%s1190_s28 + $0x8] sm:$0xff] %vm816_vm9, %v813_v62 }
 0x310   : > { %817 = vst.msk [vmem:[%s1190_s28] sm:$0xff] %vm816_vm9, %v808_v61 }
 0x311 PF: > { %s19_s13 = sadd.s32 1, %s1089_s13   ;;  %s1318_s30 = smov %s1081_s11 }
 0x312   : > { %p16_p1 = scmp.ge.s32.totalorder %s19_s13, 14   ;;  %s1319_s10 = smov %s1085_s12 }
 0x313   : > { %s1320_s11 = smov %s1323_s14  ;;  %s1321_s12 = smov %s1327_s15 }
 0x314   :  { %18 = sbr.rel (!%p16_p1) target bundleno = 3 (0x3), region = 114 }

</bundles_post_ra>
